<compile_context>
chip_gen: v7x
topology: tpu7x:2x2x1
jax: 0.10.0
libtpu: 0.0.40
codegen_flags: <defaults>
</compile_context>

<pallas_src>
import jax
import jax.numpy as jnp
from jax import lax
from jax.experimental import pallas as pl
from jax.experimental.pallas import tpu as pltpu

BLOCK_B = 8  # batch rows per grid step (= f32 sublane tile)


def lstm_classifier_kernel(
    tok_ref,      # (1, S, Bb) int32   time-major token ids for this batch block
    table0_ref,   # (Vp, 4H)  bf16     fused emb @ W_ih0 + b0 (gate-reordered, prescaled)
    w_hh0_ref,    # (H, 4H)   bf16     layer-0 hidden->gates
    w_ih1_ref,    # (H, 4H)   bf16     layer-1 input->gates
    w_hh1_ref,    # (H, 4H)   bf16     layer-1 hidden->gates
    b1_ref,       # (1, 4H)   f32      layer-1 combined bias (reordered, prescaled)
    w_proj_ref,   # (H, Cp)   bf16     projection weight (lane-padded)
    b_proj_ref,   # (1, Cp)   f32      projection bias (lane-padded)
    out_ref,      # (Bb, Cp)  f32      logits (lane-padded)
):
    _, S, Bb = tok_ref.shape
    Vp, H4 = table0_ref.shape
    H = H4 // 4
    bf16 = jnp.bfloat16

    # ---- fused embedding gather + layer-0 input->gates (one MXU matmul) ----
    tok = tok_ref[0]                                            # (S, Bb) int32
    iota_v = lax.broadcasted_iota(jnp.int32, (S, Bb, Vp), 2)
    onehot = jnp.where(tok[:, :, None] == iota_v, 1.0, 0.0).astype(bf16)
    onehot = onehot.reshape(S * Bb, Vp)                         # time-major rows
    gx0 = jnp.dot(onehot, table0_ref[...],
                  preferred_element_type=jnp.float32)           # (S*Bb, 4H) f32

    # Hoist weight loads out of the recurrence.
    w_hh0 = w_hh0_ref[...]
    w_ih1 = w_ih1_ref[...]
    w_hh1 = w_hh1_ref[...]
    b1 = b1_ref[...]

    # One dense tanh covers all four gates; per-lane affine turns the first
    # 3H lanes (i, f, o; args pre-scaled by 0.5 in the weights) into sigmoids:
    #   sigmoid(a) = 0.5 * tanh(a / 2) + 0.5 ; g lanes pass through.
    lane = lax.broadcasted_iota(jnp.int32, (1, H4), 1)
    post_scale = jnp.where(lane < 3 * H, 0.5, 1.0).astype(jnp.float32)
    post_bias = jnp.where(lane < 3 * H, 0.5, 0.0).astype(jnp.float32)

    def cell(gates, c_prev):
        act = jnp.tanh(gates) * post_scale + post_bias          # [i, f, o, g]
        i_g = act[:, 0 * H:1 * H]
        f_g = act[:, 1 * H:2 * H]
        o_g = act[:, 2 * H:3 * H]
        g_g = act[:, 3 * H:4 * H]
        c_new = f_g * c_prev + i_g * g_g
        h_new = o_g * jnp.tanh(c_new)
        return h_new, c_new

    zeros = jnp.zeros((Bb, H), jnp.float32)   # PyTorch default h0 = c0 = 0
    h0, c0 = zeros, zeros                     # layer-0 state
    h1, c1 = zeros, zeros                     # layer-1 state
    pooled = jnp.full((Bb, H), -jnp.inf, jnp.float32)
    h0_pipe = zeros                           # h0[t-1] handed to layer 1

    # ---- wavefront-fused recurrence: S+1 stages, fully unrolled (S small) ----
    for t in range(S + 1):
        if t >= 1:
            # layer-1 step (t-1): per-step input gates from h0_pipe = h0[t-1]
            g1 = (jnp.dot(h0_pipe.astype(bf16), w_ih1,
                          preferred_element_type=jnp.float32)
                  + jnp.dot(h1.astype(bf16), w_hh1,
                            preferred_element_type=jnp.float32)
                  + b1)
            h1, c1 = cell(g1, c1)
            pooled = jnp.maximum(pooled, h1)       # running AdaptiveMaxPool1d(1)
        if t < S:
            # layer-0 step t
            g0 = (jnp.dot(h0.astype(bf16), w_hh0,
                          preferred_element_type=jnp.float32)
                  + gx0[t * Bb:(t + 1) * Bb, :])
            h0, c0 = cell(g0, c0)
            h0_pipe = h0

    # Dropout is identity at inference.  Lane-dense projection (Cp = 128).
    logits = (jnp.dot(pooled.astype(bf16), w_proj_ref[...],
                      preferred_element_type=jnp.float32)
              + b_proj_ref[...])
    out_ref[...] = logits.astype(out_ref.dtype)


def make_params(key, vocab, emb_dim, hidden, num_classes, num_layers=2):
    """Deterministic xavier-uniform init mirroring the module's _init_weights."""
    def xavier(k, shape):
        fan_in, fan_out = shape[1], shape[0]
        lim = jnp.sqrt(6.0 / (fan_in + fan_out))
        return jax.random.uniform(k, shape, jnp.float32, -lim, lim)

    keys = jax.random.split(key, 4 + 4 * num_layers)
    params = {}
    params["emb"] = xavier(keys[0], (vocab, emb_dim))
    for l in range(num_layers):
        in_dim = emb_dim if l == 0 else hidden
        k_ih, k_hh, k_bih, k_bhh = keys[1 + 4 * l:5 + 4 * l]
        w_ih = xavier(k_ih, (4 * hidden, in_dim))            # torch layout (4H, in)
        w_hh = xavier(k_hh, (4 * hidden, hidden))            # torch layout (4H, H)
        klim = 1.0 / jnp.sqrt(hidden)
        b_ih = jax.random.uniform(k_bih, (4 * hidden,), jnp.float32, -klim, klim)
        b_hh = jax.random.uniform(k_bhh, (4 * hidden,), jnp.float32, -klim, klim)
        params[f"w_ih{l}"] = w_ih
        params[f"w_hh{l}"] = w_hh
        params[f"b{l}"] = b_ih + b_hh
    params["w_proj"] = xavier(keys[-1], (num_classes, hidden))  # torch layout (C, H)
    params["b_proj"] = jnp.zeros((num_classes,), jnp.float32)
    return params


def _prep_lstm_weights(w_ih, w_hh, b_combined, H):
    """torch [i,f,g,o]-ordered (4H, in) weights -> kernel layout:
       columns reordered to [i,f,o,g], sigmoid-gate columns pre-scaled by 0.5
       (so one dense tanh implements all four gates), then transposed."""
    def reord(m):   # rows (4H, X): i, f, g, o -> i, f, o, g
        return jnp.concatenate([m[0:H], m[H:2 * H], m[3 * H:4 * H], m[2 * H:3 * H]],
                               axis=0)
    scale = jnp.concatenate([jnp.full((3 * H, 1), 0.5, jnp.float32),
                             jnp.ones((H, 1), jnp.float32)], axis=0)
    w_ih_k = (reord(w_ih) * scale).T                      # (in, 4H)
    w_hh_k = (reord(w_hh) * scale).T                      # (H, 4H)
    b_k = (reord(b_combined[:, None]) * scale).T          # (1, 4H)
    return w_ih_k, w_hh_k, b_k


def lstm_text_classifier_forward(tokens, params, hidden, num_classes):
    """tokens: int32 (B, S).  Returns logits (B, C)."""
    B, S = tokens.shape
    H = hidden
    emb = params["emb"]                                   # (V, E)
    V, _ = emb.shape

    Bp = max(BLOCK_B, ((B + BLOCK_B - 1) // BLOCK_B) * BLOCK_B)
    Vp = ((V + 127) // 128) * 128                         # lane-dense one-hot K dim
    Cp = ((num_classes + 127) // 128) * 128               # lane-dense epilogue

    # Gate reorder / prescale / transpose for both layers.
    w_ih0_k, w_hh0_k, b0_k = _prep_lstm_weights(params["w_ih0"], params["w_hh0"],
                                                params["b0"], H)
    w_ih1_k, w_hh1_k, b1_k = _prep_lstm_weights(params["w_ih1"], params["w_hh1"],
                                                params["b1"], H)

    # Fuse embedding lookup with layer-0 input->gates:
    #   gather(emb, tok) @ W_ih0 + b0  ==  onehot(tok) @ (emb @ W_ih0 + b0)
    table0 = (emb @ w_ih0_k + b0_k).astype(jnp.bfloat16)   # (V, 4H)
    table0 = jnp.pad(table0, ((0, Vp - V), (0, 0)))        # padded rows never selected

    # bf16 MXU inputs; biases stay f32 (added after f32-accumulating dots).
    w_hh0_b = w_hh0_k.astype(jnp.bfloat16)
    w_ih1_b = w_ih1_k.astype(jnp.bfloat16)
    w_hh1_b = w_hh1_k.astype(jnp.bfloat16)

    w_proj = jnp.pad(params["w_proj"].T, ((0, 0), (0, Cp - num_classes)))  # (H, Cp)
    w_proj = w_proj.astype(jnp.bfloat16)
    b_proj = jnp.pad(params["b_proj"].reshape(1, -1), ((0, 0), (0, Cp - num_classes)))

    # Tokens: pad batch (token 0 rows, sliced off later), time-major, pre-blocked
    # as (nb, S, BLOCK_B) so the grid can tile batch without violating (8,128)
    # block constraints and without an in-kernel transpose.
    tok = tokens.astype(jnp.int32)
    if Bp != B:
        tok = jnp.pad(tok, ((0, Bp - B), (0, 0)))
    nb = Bp // BLOCK_B
    tok_blk = tok.T.reshape(S, nb, BLOCK_B).transpose(1, 0, 2)   # (nb, S, Bb)

    full_block = lambda shape: pl.BlockSpec(shape, lambda b: (0,) * len(shape))

    out = pl.pallas_call(
        lstm_classifier_kernel,
        out_shape=jax.ShapeDtypeStruct((Bp, Cp), jnp.float32),
        grid=(nb,),
        in_specs=[
            pl.BlockSpec((1, S, BLOCK_B), lambda b: (b, 0, 0)),   # tokens (batch block)
            full_block((Vp, 4 * H)),                              # table0
            full_block((H, 4 * H)),                               # w_hh0
            full_block((H, 4 * H)),                               # w_ih1
            full_block((H, 4 * H)),                               # w_hh1
            full_block((1, 4 * H)),                               # b1
            full_block((H, Cp)),                                  # w_proj
            full_block((1, Cp)),                                  # b_proj
        ],
        out_specs=pl.BlockSpec((BLOCK_B, Cp), lambda b: (b, 0)),
        compiler_params=pltpu.CompilerParams(
            dimension_semantics=("parallel",)),                   # v7x: 2 TCs share batch
    )(tok_blk, table0, w_hh0_b, w_ih1_b, w_hh1_b, b1_k, w_proj, b_proj)

    return out[:B, :num_classes]


def _reference_forward(tokens, params, hidden, num_classes):
    """Pure-JAX reference of the PyTorch forward (f32, standard gate order)."""
    emb = jnp.take(params["emb"], tokens, axis=0)          # (B, S, E)
    x = jnp.transpose(emb, (1, 0, 2))                      # (S, B, E)
    H = hidden

    def run_layer(x_seq, w_ih, w_hh, b):
        B = x_seq.shape[1]
        h = jnp.zeros((B, H), jnp.float32)
        c = jnp.zeros((B, H), jnp.float32)

        def step(carry, x_t):
            h, c = carry
            gates = x_t @ w_ih.T + h @ w_hh.T + b
            i = jax.nn.sigmoid(gates[:, 0 * H:1 * H])
            f = jax.nn.sigmoid(gates[:, 1 * H:2 * H])
            g = jnp.tanh(gates[:, 2 * H:3 * H])
            o = jax.nn.sigmoid(gates[:, 3 * H:4 * H])
            c = f * c + i * g
            h = o * jnp.tanh(c)
            return (h, c), h

        _, hs = lax.scan(step, (h, c), x_seq)
        return hs                                          # (S, B, H)

    h0 = run_layer(x, params["w_ih0"], params["w_hh0"], params["b0"])
    h1 = run_layer(h0, params["w_ih1"], params["w_hh1"], params["b1"])
    pooled = jnp.max(h1, axis=0)                           # (B, H)
    return pooled @ params["w_proj"].T + params["b_proj"]


if __name__ == "__main__":
    VOCAB = 50          # emb_input_dim
    EMB_DIM = 32        # emb_output_dim
    HIDDEN = 32         # hidden_size
    NUM_CLASSES = 2
    BATCH = 2
    SEQ = 8

    key = jax.random.PRNGKey(0)
    k_params, k_tokens = jax.random.split(key)

    params = make_params(k_params, VOCAB, EMB_DIM, HIDDEN, NUM_CLASSES)
    tokens = jax.random.randint(k_tokens, (BATCH, SEQ), 0, VOCAB, dtype=jnp.int32)

    logits = lstm_text_classifier_forward(tokens, params, HIDDEN, NUM_CLASSES)
    logits = jax.block_until_ready(logits)
    assert logits.shape == (BATCH, NUM_CLASSES)

    ref = _reference_forward(tokens, params, HIDDEN, NUM_CLASSES)
    # bf16 MXU inputs (f32 accumulation) -> tolerance loosened vs exact-f32 parity.
    assert jnp.allclose(logits, ref, rtol=3e-2, atol=3e-2), (logits, ref)

    print("KERNEL_OK")
</pallas_src>

<mosaic_0001>
module attributes {stable_mosaic.version = 11 : i64} {
  func.func @lstm_classifier_kernel(%arg0: i32, %arg1: memref<1x8x8xi32, #tpu.memory_space<vmem>>, %arg2: memref<128x128xbf16, #tpu.memory_space<vmem>>, %arg3: memref<32x128xbf16, #tpu.memory_space<vmem>>, %arg4: memref<32x128xbf16, #tpu.memory_space<vmem>>, %arg5: memref<32x128xbf16, #tpu.memory_space<vmem>>, %arg6: memref<1x128xf32, #tpu.memory_space<vmem>>, %arg7: memref<32x128xbf16, #tpu.memory_space<vmem>>, %arg8: memref<1x128xf32, #tpu.memory_space<vmem>>, %arg9: memref<8x128xf32, #tpu.memory_space<vmem>>) attributes {dimension_semantics = [#tpu.dimension_semantics<parallel>], iteration_bounds = array<i64: 1>, scalar_prefetch = 0 : i64, scratch_operands = 0 : i64, tpu.core_type = #tpu.core_type<tc>, window_params = [{transform_indices = @transform_0, window_bounds = array<i64: 1, 8, 8>}, {pipeline_mode = #tpu.pipeline_mode<synchronous>, transform_indices = @transform_1, window_bounds = array<i64: 128, 128>}, {pipeline_mode = #tpu.pipeline_mode<synchronous>, transform_indices = @transform_2, window_bounds = array<i64: 32, 128>}, {pipeline_mode = #tpu.pipeline_mode<synchronous>, transform_indices = @transform_3, window_bounds = array<i64: 32, 128>}, {pipeline_mode = #tpu.pipeline_mode<synchronous>, transform_indices = @transform_4, window_bounds = array<i64: 32, 128>}, {pipeline_mode = #tpu.pipeline_mode<synchronous>, transform_indices = @transform_5, window_bounds = array<i64: 1, 128>}, {pipeline_mode = #tpu.pipeline_mode<synchronous>, transform_indices = @transform_6, window_bounds = array<i64: 32, 128>}, {pipeline_mode = #tpu.pipeline_mode<synchronous>, transform_indices = @transform_7, window_bounds = array<i64: 1, 128>}, {transform_indices = @transform_8, window_bounds = array<i64: 8, 128>}]} {
    %c0 = arith.constant 0 : index
    %c0_0 = arith.constant 0 : index
    %c0_1 = arith.constant 0 : index
    %0 = vector.load %arg1[%c0, %c0_0, %c0_1] : memref<1x8x8xi32, #tpu.memory_space<vmem>>, vector<1x8x8xi32>
    %1 = vector.shape_cast %0 : vector<1x8x8xi32> to vector<8x8xi32>
    %2 = tpu.iota {dimensions = array<i32: 2>} : vector<8x8x128xi32>
    %3 = vector.shape_cast %1 : vector<8x8xi32> to vector<8x8x1xi32>
    %4 = vector.broadcast %3 : vector<8x8x1xi32> to vector<8x8x128xi32>
    %5 = arith.cmpi eq, %4, %2 : vector<8x8x128xi32>
    %cst = arith.constant 1.000000e+00 : f32
    %cst_2 = arith.constant 0.000000e+00 : f32
    %6 = vector.broadcast %cst : f32 to vector<8x8x128xf32>
    %7 = vector.broadcast %cst_2 : f32 to vector<8x8x128xf32>
    %8 = arith.select %5, %6, %7 : vector<8x8x128xi1>, vector<8x8x128xf32>
    %9 = arith.truncf %8 : vector<8x8x128xf32> to vector<8x8x128xbf16>
    %10 = vector.shape_cast %9 : vector<8x8x128xbf16> to vector<64x128xbf16>
    %c0_3 = arith.constant 0 : index
    %c0_4 = arith.constant 0 : index
    %11 = vector.load %arg2[%c0_3, %c0_4] : memref<128x128xbf16, #tpu.memory_space<vmem>>, vector<128x128xbf16>
    %cst_5 = arith.constant dense<0.000000e+00> : vector<64x128xf32>
    %12 = tpu.matmul %10, %11, %cst_5 {dimension_numbers = #tpu.dot_dimension_numbers<[1], [0], [0], [1], [0, 0, 1, 1], [], []>} : vector<64x128xbf16>, vector<128x128xbf16>, vector<64x128xf32> -> vector<64x128xf32>
    %c0_6 = arith.constant 0 : index
    %c0_7 = arith.constant 0 : index
    %13 = vector.load %arg3[%c0_6, %c0_7] : memref<32x128xbf16, #tpu.memory_space<vmem>>, vector<32x128xbf16>
    %c0_8 = arith.constant 0 : index
    %c0_9 = arith.constant 0 : index
    %14 = vector.load %arg4[%c0_8, %c0_9] : memref<32x128xbf16, #tpu.memory_space<vmem>>, vector<32x128xbf16>
    %c0_10 = arith.constant 0 : index
    %c0_11 = arith.constant 0 : index
    %15 = vector.load %arg5[%c0_10, %c0_11] : memref<32x128xbf16, #tpu.memory_space<vmem>>, vector<32x128xbf16>
    %c0_12 = arith.constant 0 : index
    %c0_13 = arith.constant 0 : index
    %16 = vector.load %arg6[%c0_12, %c0_13] : memref<1x128xf32, #tpu.memory_space<vmem>>, vector<1x128xf32>
    %17 = tpu.iota {dimensions = array<i32: 1>} : vector<1x128xi32>
    %c96_i32 = arith.constant 96 : i32
    %18 = vector.broadcast %c96_i32 : i32 to vector<1x128xi32>
    %19 = arith.cmpi slt, %17, %18 : vector<1x128xi32>
    %cst_14 = arith.constant 5.000000e-01 : f32
    %cst_15 = arith.constant 1.000000e+00 : f32
    %20 = vector.broadcast %cst_14 : f32 to vector<1x128xf32>
    %21 = vector.broadcast %cst_15 : f32 to vector<1x128xf32>
    %22 = arith.select %19, %20, %21 : vector<1x128xi1>, vector<1x128xf32>
    %c96_i32_16 = arith.constant 96 : i32
    %23 = vector.broadcast %c96_i32_16 : i32 to vector<1x128xi32>
    %24 = arith.cmpi slt, %17, %23 : vector<1x128xi32>
    %cst_17 = arith.constant 5.000000e-01 : f32
    %cst_18 = arith.constant 0.000000e+00 : f32
    %25 = vector.broadcast %cst_17 : f32 to vector<1x128xf32>
    %26 = vector.broadcast %cst_18 : f32 to vector<1x128xf32>
    %27 = arith.select %24, %25, %26 : vector<1x128xi1>, vector<1x128xf32>
    %cst_19 = arith.constant 0.000000e+00 : f32
    %28 = vector.broadcast %cst_19 : f32 to vector<8x32xf32>
    %cst_20 = arith.constant 0xFF800000 : f32
    %29 = vector.broadcast %cst_20 : f32 to vector<8x32xf32>
    %30 = arith.truncf %28 : vector<8x32xf32> to vector<8x32xbf16>
    %cst_21 = arith.constant dense<0.000000e+00> : vector<8x128xf32>
    %31 = tpu.matmul %30, %13, %cst_21 {dimension_numbers = #tpu.dot_dimension_numbers<[1], [0], [0], [1], [0, 0, 1, 1], [], []>} : vector<8x32xbf16>, vector<32x128xbf16>, vector<8x128xf32> -> vector<8x128xf32>
    %32 = vector.extract_strided_slice %12 {offsets = [0, 0], sizes = [8, 128], strides = [1, 1]} : vector<64x128xf32> to vector<8x128xf32>
    %33 = arith.addf %31, %32 : vector<8x128xf32>
    %34 = math.tanh %33 : vector<8x128xf32>
    %35 = vector.broadcast %22 : vector<1x128xf32> to vector<8x128xf32>
    %36 = arith.mulf %34, %35 : vector<8x128xf32>
    %37 = vector.broadcast %27 : vector<1x128xf32> to vector<8x128xf32>
    %38 = arith.addf %36, %37 : vector<8x128xf32>
    %39 = vector.extract_strided_slice %38 {offsets = [0, 0], sizes = [8, 32], strides = [1, 1]} : vector<8x128xf32> to vector<8x32xf32>
    %40 = vector.extract_strided_slice %38 {offsets = [0, 32], sizes = [8, 32], strides = [1, 1]} : vector<8x128xf32> to vector<8x32xf32>
    %41 = vector.extract_strided_slice %38 {offsets = [0, 64], sizes = [8, 32], strides = [1, 1]} : vector<8x128xf32> to vector<8x32xf32>
    %42 = vector.extract_strided_slice %38 {offsets = [0, 96], sizes = [8, 32], strides = [1, 1]} : vector<8x128xf32> to vector<8x32xf32>
    %43 = arith.mulf %40, %28 : vector<8x32xf32>
    %44 = arith.mulf %39, %42 : vector<8x32xf32>
    %45 = arith.addf %43, %44 : vector<8x32xf32>
    %46 = math.tanh %45 : vector<8x32xf32>
    %47 = arith.mulf %41, %46 : vector<8x32xf32>
    %48 = arith.truncf %47 : vector<8x32xf32> to vector<8x32xbf16>
    %cst_22 = arith.constant dense<0.000000e+00> : vector<8x128xf32>
    %49 = tpu.matmul %48, %14, %cst_22 {dimension_numbers = #tpu.dot_dimension_numbers<[1], [0], [0], [1], [0, 0, 1, 1], [], []>} : vector<8x32xbf16>, vector<32x128xbf16>, vector<8x128xf32> -> vector<8x128xf32>
    %50 = arith.truncf %28 : vector<8x32xf32> to vector<8x32xbf16>
    %cst_23 = arith.constant dense<0.000000e+00> : vector<8x128xf32>
    %51 = tpu.matmul %50, %15, %cst_23 {dimension_numbers = #tpu.dot_dimension_numbers<[1], [0], [0], [1], [0, 0, 1, 1], [], []>} : vector<8x32xbf16>, vector<32x128xbf16>, vector<8x128xf32> -> vector<8x128xf32>
    %52 = arith.addf %49, %51 : vector<8x128xf32>
    %53 = vector.broadcast %16 : vector<1x128xf32> to vector<8x128xf32>
    %54 = arith.addf %52, %53 : vector<8x128xf32>
    %55 = math.tanh %54 : vector<8x128xf32>
    %56 = vector.broadcast %22 : vector<1x128xf32> to vector<8x128xf32>
    %57 = arith.mulf %55, %56 : vector<8x128xf32>
    %58 = vector.broadcast %27 : vector<1x128xf32> to vector<8x128xf32>
    %59 = arith.addf %57, %58 : vector<8x128xf32>
    %60 = vector.extract_strided_slice %59 {offsets = [0, 0], sizes = [8, 32], strides = [1, 1]} : vector<8x128xf32> to vector<8x32xf32>
    %61 = vector.extract_strided_slice %59 {offsets = [0, 32], sizes = [8, 32], strides = [1, 1]} : vector<8x128xf32> to vector<8x32xf32>
    %62 = vector.extract_strided_slice %59 {offsets = [0, 64], sizes = [8, 32], strides = [1, 1]} : vector<8x128xf32> to vector<8x32xf32>
    %63 = vector.extract_strided_slice %59 {offsets = [0, 96], sizes = [8, 32], strides = [1, 1]} : vector<8x128xf32> to vector<8x32xf32>
    %64 = arith.mulf %61, %28 : vector<8x32xf32>
    %65 = arith.mulf %60, %63 : vector<8x32xf32>
    %66 = arith.addf %64, %65 : vector<8x32xf32>
    %67 = math.tanh %66 : vector<8x32xf32>
    %68 = arith.mulf %62, %67 : vector<8x32xf32>
    %69 = arith.maximumf %29, %68 : vector<8x32xf32>
    %70 = arith.truncf %47 : vector<8x32xf32> to vector<8x32xbf16>
    %cst_24 = arith.constant dense<0.000000e+00> : vector<8x128xf32>
    %71 = tpu.matmul %70, %13, %cst_24 {dimension_numbers = #tpu.dot_dimension_numbers<[1], [0], [0], [1], [0, 0, 1, 1], [], []>} : vector<8x32xbf16>, vector<32x128xbf16>, vector<8x128xf32> -> vector<8x128xf32>
    %72 = vector.extract_strided_slice %12 {offsets = [8, 0], sizes = [8, 128], strides = [1, 1]} : vector<64x128xf32> to vector<8x128xf32>
    %73 = arith.addf %71, %72 : vector<8x128xf32>
    %74 = math.tanh %73 : vector<8x128xf32>
    %75 = vector.broadcast %22 : vector<1x128xf32> to vector<8x128xf32>
    %76 = arith.mulf %74, %75 : vector<8x128xf32>
    %77 = vector.broadcast %27 : vector<1x128xf32> to vector<8x128xf32>
    %78 = arith.addf %76, %77 : vector<8x128xf32>
    %79 = vector.extract_strided_slice %78 {offsets = [0, 0], sizes = [8, 32], strides = [1, 1]} : vector<8x128xf32> to vector<8x32xf32>
    %80 = vector.extract_strided_slice %78 {offsets = [0, 32], sizes = [8, 32], strides = [1, 1]} : vector<8x128xf32> to vector<8x32xf32>
    %81 = vector.extract_strided_slice %78 {offsets = [0, 64], sizes = [8, 32], strides = [1, 1]} : vector<8x128xf32> to vector<8x32xf32>
    %82 = vector.extract_strided_slice %78 {offsets = [0, 96], sizes = [8, 32], strides = [1, 1]} : vector<8x128xf32> to vector<8x32xf32>
    %83 = arith.mulf %80, %45 : vector<8x32xf32>
    %84 = arith.mulf %79, %82 : vector<8x32xf32>
    %85 = arith.addf %83, %84 : vector<8x32xf32>
    %86 = math.tanh %85 : vector<8x32xf32>
    %87 = arith.mulf %81, %86 : vector<8x32xf32>
    %88 = arith.truncf %87 : vector<8x32xf32> to vector<8x32xbf16>
    %cst_25 = arith.constant dense<0.000000e+00> : vector<8x128xf32>
    %89 = tpu.matmul %88, %14, %cst_25 {dimension_numbers = #tpu.dot_dimension_numbers<[1], [0], [0], [1], [0, 0, 1, 1], [], []>} : vector<8x32xbf16>, vector<32x128xbf16>, vector<8x128xf32> -> vector<8x128xf32>
    %90 = arith.truncf %68 : vector<8x32xf32> to vector<8x32xbf16>
    %cst_26 = arith.constant dense<0.000000e+00> : vector<8x128xf32>
    %91 = tpu.matmul %90, %15, %cst_26 {dimension_numbers = #tpu.dot_dimension_numbers<[1], [0], [0], [1], [0, 0, 1, 1], [], []>} : vector<8x32xbf16>, vector<32x128xbf16>, vector<8x128xf32> -> vector<8x128xf32>
    %92 = arith.addf %89, %91 : vector<8x128xf32>
    %93 = vector.broadcast %16 : vector<1x128xf32> to vector<8x128xf32>
    %94 = arith.addf %92, %93 : vector<8x128xf32>
    %95 = math.tanh %94 : vector<8x128xf32>
    %96 = vector.broadcast %22 : vector<1x128xf32> to vector<8x128xf32>
    %97 = arith.mulf %95, %96 : vector<8x128xf32>
    %98 = vector.broadcast %27 : vector<1x128xf32> to vector<8x128xf32>
    %99 = arith.addf %97, %98 : vector<8x128xf32>
    %100 = vector.extract_strided_slice %99 {offsets = [0, 0], sizes = [8, 32], strides = [1, 1]} : vector<8x128xf32> to vector<8x32xf32>
    %101 = vector.extract_strided_slice %99 {offsets = [0, 32], sizes = [8, 32], strides = [1, 1]} : vector<8x128xf32> to vector<8x32xf32>
    %102 = vector.extract_strided_slice %99 {offsets = [0, 64], sizes = [8, 32], strides = [1, 1]} : vector<8x128xf32> to vector<8x32xf32>
    %103 = vector.extract_strided_slice %99 {offsets = [0, 96], sizes = [8, 32], strides = [1, 1]} : vector<8x128xf32> to vector<8x32xf32>
    %104 = arith.mulf %101, %66 : vector<8x32xf32>
    %105 = arith.mulf %100, %103 : vector<8x32xf32>
    %106 = arith.addf %104, %105 : vector<8x32xf32>
    %107 = math.tanh %106 : vector<8x32xf32>
    %108 = arith.mulf %102, %107 : vector<8x32xf32>
    %109 = arith.maximumf %69, %108 : vector<8x32xf32>
    %110 = arith.truncf %87 : vector<8x32xf32> to vector<8x32xbf16>
    %cst_27 = arith.constant dense<0.000000e+00> : vector<8x128xf32>
    %111 = tpu.matmul %110, %13, %cst_27 {dimension_numbers = #tpu.dot_dimension_numbers<[1], [0], [0], [1], [0, 0, 1, 1], [], []>} : vector<8x32xbf16>, vector<32x128xbf16>, vector<8x128xf32> -> vector<8x128xf32>
    %112 = vector.extract_strided_slice %12 {offsets = [16, 0], sizes = [8, 128], strides = [1, 1]} : vector<64x128xf32> to vector<8x128xf32>
    %113 = arith.addf %111, %112 : vector<8x128xf32>
    %114 = math.tanh %113 : vector<8x128xf32>
    %115 = vector.broadcast %22 : vector<1x128xf32> to vector<8x128xf32>
    %116 = arith.mulf %114, %115 : vector<8x128xf32>
    %117 = vector.broadcast %27 : vector<1x128xf32> to vector<8x128xf32>
    %118 = arith.addf %116, %117 : vector<8x128xf32>
    %119 = vector.extract_strided_slice %118 {offsets = [0, 0], sizes = [8, 32], strides = [1, 1]} : vector<8x128xf32> to vector<8x32xf32>
    %120 = vector.extract_strided_slice %118 {offsets = [0, 32], sizes = [8, 32], strides = [1, 1]} : vector<8x128xf32> to vector<8x32xf32>
    %121 = vector.extract_strided_slice %118 {offsets = [0, 64], sizes = [8, 32], strides = [1, 1]} : vector<8x128xf32> to vector<8x32xf32>
    %122 = vector.extract_strided_slice %118 {offsets = [0, 96], sizes = [8, 32], strides = [1, 1]} : vector<8x128xf32> to vector<8x32xf32>
    %123 = arith.mulf %120, %85 : vector<8x32xf32>
    %124 = arith.mulf %119, %122 : vector<8x32xf32>
    %125 = arith.addf %123, %124 : vector<8x32xf32>
    %126 = math.tanh %125 : vector<8x32xf32>
    %127 = arith.mulf %121, %126 : vector<8x32xf32>
    %128 = arith.truncf %127 : vector<8x32xf32> to vector<8x32xbf16>
    %cst_28 = arith.constant dense<0.000000e+00> : vector<8x128xf32>
    %129 = tpu.matmul %128, %14, %cst_28 {dimension_numbers = #tpu.dot_dimension_numbers<[1], [0], [0], [1], [0, 0, 1, 1], [], []>} : vector<8x32xbf16>, vector<32x128xbf16>, vector<8x128xf32> -> vector<8x128xf32>
    %130 = arith.truncf %108 : vector<8x32xf32> to vector<8x32xbf16>
    %cst_29 = arith.constant dense<0.000000e+00> : vector<8x128xf32>
    %131 = tpu.matmul %130, %15, %cst_29 {dimension_numbers = #tpu.dot_dimension_numbers<[1], [0], [0], [1], [0, 0, 1, 1], [], []>} : vector<8x32xbf16>, vector<32x128xbf16>, vector<8x128xf32> -> vector<8x128xf32>
    %132 = arith.addf %129, %131 : vector<8x128xf32>
    %133 = vector.broadcast %16 : vector<1x128xf32> to vector<8x128xf32>
    %134 = arith.addf %132, %133 : vector<8x128xf32>
    %135 = math.tanh %134 : vector<8x128xf32>
    %136 = vector.broadcast %22 : vector<1x128xf32> to vector<8x128xf32>
    %137 = arith.mulf %135, %136 : vector<8x128xf32>
    %138 = vector.broadcast %27 : vector<1x128xf32> to vector<8x128xf32>
    %139 = arith.addf %137, %138 : vector<8x128xf32>
    %140 = vector.extract_strided_slice %139 {offsets = [0, 0], sizes = [8, 32], strides = [1, 1]} : vector<8x128xf32> to vector<8x32xf32>
    %141 = vector.extract_strided_slice %139 {offsets = [0, 32], sizes = [8, 32], strides = [1, 1]} : vector<8x128xf32> to vector<8x32xf32>
    %142 = vector.extract_strided_slice %139 {offsets = [0, 64], sizes = [8, 32], strides = [1, 1]} : vector<8x128xf32> to vector<8x32xf32>
    %143 = vector.extract_strided_slice %139 {offsets = [0, 96], sizes = [8, 32], strides = [1, 1]} : vector<8x128xf32> to vector<8x32xf32>
    %144 = arith.mulf %141, %106 : vector<8x32xf32>
    %145 = arith.mulf %140, %143 : vector<8x32xf32>
    %146 = arith.addf %144, %145 : vector<8x32xf32>
    %147 = math.tanh %146 : vector<8x32xf32>
    %148 = arith.mulf %142, %147 : vector<8x32xf32>
    %149 = arith.maximumf %109, %148 : vector<8x32xf32>
    %150 = arith.truncf %127 : vector<8x32xf32> to vector<8x32xbf16>
    %cst_30 = arith.constant dense<0.000000e+00> : vector<8x128xf32>
    %151 = tpu.matmul %150, %13, %cst_30 {dimension_numbers = #tpu.dot_dimension_numbers<[1], [0], [0], [1], [0, 0, 1, 1], [], []>} : vector<8x32xbf16>, vector<32x128xbf16>, vector<8x128xf32> -> vector<8x128xf32>
    %152 = vector.extract_strided_slice %12 {offsets = [24, 0], sizes = [8, 128], strides = [1, 1]} : vector<64x128xf32> to vector<8x128xf32>
    %153 = arith.addf %151, %152 : vector<8x128xf32>
    %154 = math.tanh %153 : vector<8x128xf32>
    %155 = vector.broadcast %22 : vector<1x128xf32> to vector<8x128xf32>
    %156 = arith.mulf %154, %155 : vector<8x128xf32>
    %157 = vector.broadcast %27 : vector<1x128xf32> to vector<8x128xf32>
    %158 = arith.addf %156, %157 : vector<8x128xf32>
    %159 = vector.extract_strided_slice %158 {offsets = [0, 0], sizes = [8, 32], strides = [1, 1]} : vector<8x128xf32> to vector<8x32xf32>
    %160 = vector.extract_strided_slice %158 {offsets = [0, 32], sizes = [8, 32], strides = [1, 1]} : vector<8x128xf32> to vector<8x32xf32>
    %161 = vector.extract_strided_slice %158 {offsets = [0, 64], sizes = [8, 32], strides = [1, 1]} : vector<8x128xf32> to vector<8x32xf32>
    %162 = vector.extract_strided_slice %158 {offsets = [0, 96], sizes = [8, 32], strides = [1, 1]} : vector<8x128xf32> to vector<8x32xf32>
    %163 = arith.mulf %160, %125 : vector<8x32xf32>
    %164 = arith.mulf %159, %162 : vector<8x32xf32>
    %165 = arith.addf %163, %164 : vector<8x32xf32>
    %166 = math.tanh %165 : vector<8x32xf32>
    %167 = arith.mulf %161, %166 : vector<8x32xf32>
    %168 = arith.truncf %167 : vector<8x32xf32> to vector<8x32xbf16>
    %cst_31 = arith.constant dense<0.000000e+00> : vector<8x128xf32>
    %169 = tpu.matmul %168, %14, %cst_31 {dimension_numbers = #tpu.dot_dimension_numbers<[1], [0], [0], [1], [0, 0, 1, 1], [], []>} : vector<8x32xbf16>, vector<32x128xbf16>, vector<8x128xf32> -> vector<8x128xf32>
    %170 = arith.truncf %148 : vector<8x32xf32> to vector<8x32xbf16>
    %cst_32 = arith.constant dense<0.000000e+00> : vector<8x128xf32>
    %171 = tpu.matmul %170, %15, %cst_32 {dimension_numbers = #tpu.dot_dimension_numbers<[1], [0], [0], [1], [0, 0, 1, 1], [], []>} : vector<8x32xbf16>, vector<32x128xbf16>, vector<8x128xf32> -> vector<8x128xf32>
    %172 = arith.addf %169, %171 : vector<8x128xf32>
    %173 = vector.broadcast %16 : vector<1x128xf32> to vector<8x128xf32>
    %174 = arith.addf %172, %173 : vector<8x128xf32>
    %175 = math.tanh %174 : vector<8x128xf32>
    %176 = vector.broadcast %22 : vector<1x128xf32> to vector<8x128xf32>
    %177 = arith.mulf %175, %176 : vector<8x128xf32>
    %178 = vector.broadcast %27 : vector<1x128xf32> to vector<8x128xf32>
    %179 = arith.addf %177, %178 : vector<8x128xf32>
    %180 = vector.extract_strided_slice %179 {offsets = [0, 0], sizes = [8, 32], strides = [1, 1]} : vector<8x128xf32> to vector<8x32xf32>
    %181 = vector.extract_strided_slice %179 {offsets = [0, 32], sizes = [8, 32], strides = [1, 1]} : vector<8x128xf32> to vector<8x32xf32>
    %182 = vector.extract_strided_slice %179 {offsets = [0, 64], sizes = [8, 32], strides = [1, 1]} : vector<8x128xf32> to vector<8x32xf32>
    %183 = vector.extract_strided_slice %179 {offsets = [0, 96], sizes = [8, 32], strides = [1, 1]} : vector<8x128xf32> to vector<8x32xf32>
    %184 = arith.mulf %181, %146 : vector<8x32xf32>
    %185 = arith.mulf %180, %183 : vector<8x32xf32>
    %186 = arith.addf %184, %185 : vector<8x32xf32>
    %187 = math.tanh %186 : vector<8x32xf32>
    %188 = arith.mulf %182, %187 : vector<8x32xf32>
    %189 = arith.maximumf %149, %188 : vector<8x32xf32>
    %190 = arith.truncf %167 : vector<8x32xf32> to vector<8x32xbf16>
    %cst_33 = arith.constant dense<0.000000e+00> : vector<8x128xf32>
    %191 = tpu.matmul %190, %13, %cst_33 {dimension_numbers = #tpu.dot_dimension_numbers<[1], [0], [0], [1], [0, 0, 1, 1], [], []>} : vector<8x32xbf16>, vector<32x128xbf16>, vector<8x128xf32> -> vector<8x128xf32>
    %192 = vector.extract_strided_slice %12 {offsets = [32, 0], sizes = [8, 128], strides = [1, 1]} : vector<64x128xf32> to vector<8x128xf32>
    %193 = arith.addf %191, %192 : vector<8x128xf32>
    %194 = math.tanh %193 : vector<8x128xf32>
    %195 = vector.broadcast %22 : vector<1x128xf32> to vector<8x128xf32>
    %196 = arith.mulf %194, %195 : vector<8x128xf32>
    %197 = vector.broadcast %27 : vector<1x128xf32> to vector<8x128xf32>
    %198 = arith.addf %196, %197 : vector<8x128xf32>
    %199 = vector.extract_strided_slice %198 {offsets = [0, 0], sizes = [8, 32], strides = [1, 1]} : vector<8x128xf32> to vector<8x32xf32>
    %200 = vector.extract_strided_slice %198 {offsets = [0, 32], sizes = [8, 32], strides = [1, 1]} : vector<8x128xf32> to vector<8x32xf32>
    %201 = vector.extract_strided_slice %198 {offsets = [0, 64], sizes = [8, 32], strides = [1, 1]} : vector<8x128xf32> to vector<8x32xf32>
    %202 = vector.extract_strided_slice %198 {offsets = [0, 96], sizes = [8, 32], strides = [1, 1]} : vector<8x128xf32> to vector<8x32xf32>
    %203 = arith.mulf %200, %165 : vector<8x32xf32>
    %204 = arith.mulf %199, %202 : vector<8x32xf32>
    %205 = arith.addf %203, %204 : vector<8x32xf32>
    %206 = math.tanh %205 : vector<8x32xf32>
    %207 = arith.mulf %201, %206 : vector<8x32xf32>
    %208 = arith.truncf %207 : vector<8x32xf32> to vector<8x32xbf16>
    %cst_34 = arith.constant dense<0.000000e+00> : vector<8x128xf32>
    %209 = tpu.matmul %208, %14, %cst_34 {dimension_numbers = #tpu.dot_dimension_numbers<[1], [0], [0], [1], [0, 0, 1, 1], [], []>} : vector<8x32xbf16>, vector<32x128xbf16>, vector<8x128xf32> -> vector<8x128xf32>
    %210 = arith.truncf %188 : vector<8x32xf32> to vector<8x32xbf16>
    %cst_35 = arith.constant dense<0.000000e+00> : vector<8x128xf32>
    %211 = tpu.matmul %210, %15, %cst_35 {dimension_numbers = #tpu.dot_dimension_numbers<[1], [0], [0], [1], [0, 0, 1, 1], [], []>} : vector<8x32xbf16>, vector<32x128xbf16>, vector<8x128xf32> -> vector<8x128xf32>
    %212 = arith.addf %209, %211 : vector<8x128xf32>
    %213 = vector.broadcast %16 : vector<1x128xf32> to vector<8x128xf32>
    %214 = arith.addf %212, %213 : vector<8x128xf32>
    %215 = math.tanh %214 : vector<8x128xf32>
    %216 = vector.broadcast %22 : vector<1x128xf32> to vector<8x128xf32>
    %217 = arith.mulf %215, %216 : vector<8x128xf32>
    %218 = vector.broadcast %27 : vector<1x128xf32> to vector<8x128xf32>
    %219 = arith.addf %217, %218 : vector<8x128xf32>
    %220 = vector.extract_strided_slice %219 {offsets = [0, 0], sizes = [8, 32], strides = [1, 1]} : vector<8x128xf32> to vector<8x32xf32>
    %221 = vector.extract_strided_slice %219 {offsets = [0, 32], sizes = [8, 32], strides = [1, 1]} : vector<8x128xf32> to vector<8x32xf32>
    %222 = vector.extract_strided_slice %219 {offsets = [0, 64], sizes = [8, 32], strides = [1, 1]} : vector<8x128xf32> to vector<8x32xf32>
    %223 = vector.extract_strided_slice %219 {offsets = [0, 96], sizes = [8, 32], strides = [1, 1]} : vector<8x128xf32> to vector<8x32xf32>
    %224 = arith.mulf %221, %186 : vector<8x32xf32>
    %225 = arith.mulf %220, %223 : vector<8x32xf32>
    %226 = arith.addf %224, %225 : vector<8x32xf32>
    %227 = math.tanh %226 : vector<8x32xf32>
    %228 = arith.mulf %222, %227 : vector<8x32xf32>
    %229 = arith.maximumf %189, %228 : vector<8x32xf32>
    %230 = arith.truncf %207 : vector<8x32xf32> to vector<8x32xbf16>
    %cst_36 = arith.constant dense<0.000000e+00> : vector<8x128xf32>
    %231 = tpu.matmul %230, %13, %cst_36 {dimension_numbers = #tpu.dot_dimension_numbers<[1], [0], [0], [1], [0, 0, 1, 1], [], []>} : vector<8x32xbf16>, vector<32x128xbf16>, vector<8x128xf32> -> vector<8x128xf32>
    %232 = vector.extract_strided_slice %12 {offsets = [40, 0], sizes = [8, 128], strides = [1, 1]} : vector<64x128xf32> to vector<8x128xf32>
    %233 = arith.addf %231, %232 : vector<8x128xf32>
    %234 = math.tanh %233 : vector<8x128xf32>
    %235 = vector.broadcast %22 : vector<1x128xf32> to vector<8x128xf32>
    %236 = arith.mulf %234, %235 : vector<8x128xf32>
    %237 = vector.broadcast %27 : vector<1x128xf32> to vector<8x128xf32>
    %238 = arith.addf %236, %237 : vector<8x128xf32>
    %239 = vector.extract_strided_slice %238 {offsets = [0, 0], sizes = [8, 32], strides = [1, 1]} : vector<8x128xf32> to vector<8x32xf32>
    %240 = vector.extract_strided_slice %238 {offsets = [0, 32], sizes = [8, 32], strides = [1, 1]} : vector<8x128xf32> to vector<8x32xf32>
    %241 = vector.extract_strided_slice %238 {offsets = [0, 64], sizes = [8, 32], strides = [1, 1]} : vector<8x128xf32> to vector<8x32xf32>
    %242 = vector.extract_strided_slice %238 {offsets = [0, 96], sizes = [8, 32], strides = [1, 1]} : vector<8x128xf32> to vector<8x32xf32>
    %243 = arith.mulf %240, %205 : vector<8x32xf32>
    %244 = arith.mulf %239, %242 : vector<8x32xf32>
    %245 = arith.addf %243, %244 : vector<8x32xf32>
    %246 = math.tanh %245 : vector<8x32xf32>
    %247 = arith.mulf %241, %246 : vector<8x32xf32>
    %248 = arith.truncf %247 : vector<8x32xf32> to vector<8x32xbf16>
    %cst_37 = arith.constant dense<0.000000e+00> : vector<8x128xf32>
    %249 = tpu.matmul %248, %14, %cst_37 {dimension_numbers = #tpu.dot_dimension_numbers<[1], [0], [0], [1], [0, 0, 1, 1], [], []>} : vector<8x32xbf16>, vector<32x128xbf16>, vector<8x128xf32> -> vector<8x128xf32>
    %250 = arith.truncf %228 : vector<8x32xf32> to vector<8x32xbf16>
    %cst_38 = arith.constant dense<0.000000e+00> : vector<8x128xf32>
    %251 = tpu.matmul %250, %15, %cst_38 {dimension_numbers = #tpu.dot_dimension_numbers<[1], [0], [0], [1], [0, 0, 1, 1], [], []>} : vector<8x32xbf16>, vector<32x128xbf16>, vector<8x128xf32> -> vector<8x128xf32>
    %252 = arith.addf %249, %251 : vector<8x128xf32>
    %253 = vector.broadcast %16 : vector<1x128xf32> to vector<8x128xf32>
    %254 = arith.addf %252, %253 : vector<8x128xf32>
    %255 = math.tanh %254 : vector<8x128xf32>
    %256 = vector.broadcast %22 : vector<1x128xf32> to vector<8x128xf32>
    %257 = arith.mulf %255, %256 : vector<8x128xf32>
    %258 = vector.broadcast %27 : vector<1x128xf32> to vector<8x128xf32>
    %259 = arith.addf %257, %258 : vector<8x128xf32>
    %260 = vector.extract_strided_slice %259 {offsets = [0, 0], sizes = [8, 32], strides = [1, 1]} : vector<8x128xf32> to vector<8x32xf32>
    %261 = vector.extract_strided_slice %259 {offsets = [0, 32], sizes = [8, 32], strides = [1, 1]} : vector<8x128xf32> to vector<8x32xf32>
    %262 = vector.extract_strided_slice %259 {offsets = [0, 64], sizes = [8, 32], strides = [1, 1]} : vector<8x128xf32> to vector<8x32xf32>
    %263 = vector.extract_strided_slice %259 {offsets = [0, 96], sizes = [8, 32], strides = [1, 1]} : vector<8x128xf32> to vector<8x32xf32>
    %264 = arith.mulf %261, %226 : vector<8x32xf32>
    %265 = arith.mulf %260, %263 : vector<8x32xf32>
    %266 = arith.addf %264, %265 : vector<8x32xf32>
    %267 = math.tanh %266 : vector<8x32xf32>
    %268 = arith.mulf %262, %267 : vector<8x32xf32>
    %269 = arith.maximumf %229, %268 : vector<8x32xf32>
    %270 = arith.truncf %247 : vector<8x32xf32> to vector<8x32xbf16>
    %cst_39 = arith.constant dense<0.000000e+00> : vector<8x128xf32>
    %271 = tpu.matmul %270, %13, %cst_39 {dimension_numbers = #tpu.dot_dimension_numbers<[1], [0], [0], [1], [0, 0, 1, 1], [], []>} : vector<8x32xbf16>, vector<32x128xbf16>, vector<8x128xf32> -> vector<8x128xf32>
    %272 = vector.extract_strided_slice %12 {offsets = [48, 0], sizes = [8, 128], strides = [1, 1]} : vector<64x128xf32> to vector<8x128xf32>
    %273 = arith.addf %271, %272 : vector<8x128xf32>
    %274 = math.tanh %273 : vector<8x128xf32>
    %275 = vector.broadcast %22 : vector<1x128xf32> to vector<8x128xf32>
    %276 = arith.mulf %274, %275 : vector<8x128xf32>
    %277 = vector.broadcast %27 : vector<1x128xf32> to vector<8x128xf32>
    %278 = arith.addf %276, %277 : vector<8x128xf32>
    %279 = vector.extract_strided_slice %278 {offsets = [0, 0], sizes = [8, 32], strides = [1, 1]} : vector<8x128xf32> to vector<8x32xf32>
    %280 = vector.extract_strided_slice %278 {offsets = [0, 32], sizes = [8, 32], strides = [1, 1]} : vector<8x128xf32> to vector<8x32xf32>
    %281 = vector.extract_strided_slice %278 {offsets = [0, 64], sizes = [8, 32], strides = [1, 1]} : vector<8x128xf32> to vector<8x32xf32>
    %282 = vector.extract_strided_slice %278 {offsets = [0, 96], sizes = [8, 32], strides = [1, 1]} : vector<8x128xf32> to vector<8x32xf32>
    %283 = arith.mulf %280, %245 : vector<8x32xf32>
    %284 = arith.mulf %279, %282 : vector<8x32xf32>
    %285 = arith.addf %283, %284 : vector<8x32xf32>
    %286 = math.tanh %285 : vector<8x32xf32>
    %287 = arith.mulf %281, %286 : vector<8x32xf32>
    %288 = arith.truncf %287 : vector<8x32xf32> to vector<8x32xbf16>
    %cst_40 = arith.constant dense<0.000000e+00> : vector<8x128xf32>
    %289 = tpu.matmul %288, %14, %cst_40 {dimension_numbers = #tpu.dot_dimension_numbers<[1], [0], [0], [1], [0, 0, 1, 1], [], []>} : vector<8x32xbf16>, vector<32x128xbf16>, vector<8x128xf32> -> vector<8x128xf32>
    %290 = arith.truncf %268 : vector<8x32xf32> to vector<8x32xbf16>
    %cst_41 = arith.constant dense<0.000000e+00> : vector<8x128xf32>
    %291 = tpu.matmul %290, %15, %cst_41 {dimension_numbers = #tpu.dot_dimension_numbers<[1], [0], [0], [1], [0, 0, 1, 1], [], []>} : vector<8x32xbf16>, vector<32x128xbf16>, vector<8x128xf32> -> vector<8x128xf32>
    %292 = arith.addf %289, %291 : vector<8x128xf32>
    %293 = vector.broadcast %16 : vector<1x128xf32> to vector<8x128xf32>
    %294 = arith.addf %292, %293 : vector<8x128xf32>
    %295 = math.tanh %294 : vector<8x128xf32>
    %296 = vector.broadcast %22 : vector<1x128xf32> to vector<8x128xf32>
    %297 = arith.mulf %295, %296 : vector<8x128xf32>
    %298 = vector.broadcast %27 : vector<1x128xf32> to vector<8x128xf32>
    %299 = arith.addf %297, %298 : vector<8x128xf32>
    %300 = vector.extract_strided_slice %299 {offsets = [0, 0], sizes = [8, 32], strides = [1, 1]} : vector<8x128xf32> to vector<8x32xf32>
    %301 = vector.extract_strided_slice %299 {offsets = [0, 32], sizes = [8, 32], strides = [1, 1]} : vector<8x128xf32> to vector<8x32xf32>
    %302 = vector.extract_strided_slice %299 {offsets = [0, 64], sizes = [8, 32], strides = [1, 1]} : vector<8x128xf32> to vector<8x32xf32>
    %303 = vector.extract_strided_slice %299 {offsets = [0, 96], sizes = [8, 32], strides = [1, 1]} : vector<8x128xf32> to vector<8x32xf32>
    %304 = arith.mulf %301, %266 : vector<8x32xf32>
    %305 = arith.mulf %300, %303 : vector<8x32xf32>
    %306 = arith.addf %304, %305 : vector<8x32xf32>
    %307 = math.tanh %306 : vector<8x32xf32>
    %308 = arith.mulf %302, %307 : vector<8x32xf32>
    %309 = arith.maximumf %269, %308 : vector<8x32xf32>
    %310 = arith.truncf %287 : vector<8x32xf32> to vector<8x32xbf16>
    %cst_42 = arith.constant dense<0.000000e+00> : vector<8x128xf32>
    %311 = tpu.matmul %310, %13, %cst_42 {dimension_numbers = #tpu.dot_dimension_numbers<[1], [0], [0], [1], [0, 0, 1, 1], [], []>} : vector<8x32xbf16>, vector<32x128xbf16>, vector<8x128xf32> -> vector<8x128xf32>
    %312 = vector.extract_strided_slice %12 {offsets = [56, 0], sizes = [8, 128], strides = [1, 1]} : vector<64x128xf32> to vector<8x128xf32>
    %313 = arith.addf %311, %312 : vector<8x128xf32>
    %314 = math.tanh %313 : vector<8x128xf32>
    %315 = vector.broadcast %22 : vector<1x128xf32> to vector<8x128xf32>
    %316 = arith.mulf %314, %315 : vector<8x128xf32>
    %317 = vector.broadcast %27 : vector<1x128xf32> to vector<8x128xf32>
    %318 = arith.addf %316, %317 : vector<8x128xf32>
    %319 = vector.extract_strided_slice %318 {offsets = [0, 0], sizes = [8, 32], strides = [1, 1]} : vector<8x128xf32> to vector<8x32xf32>
    %320 = vector.extract_strided_slice %318 {offsets = [0, 32], sizes = [8, 32], strides = [1, 1]} : vector<8x128xf32> to vector<8x32xf32>
    %321 = vector.extract_strided_slice %318 {offsets = [0, 64], sizes = [8, 32], strides = [1, 1]} : vector<8x128xf32> to vector<8x32xf32>
    %322 = vector.extract_strided_slice %318 {offsets = [0, 96], sizes = [8, 32], strides = [1, 1]} : vector<8x128xf32> to vector<8x32xf32>
    %323 = arith.mulf %320, %285 : vector<8x32xf32>
    %324 = arith.mulf %319, %322 : vector<8x32xf32>
    %325 = arith.addf %323, %324 : vector<8x32xf32>
    %326 = math.tanh %325 : vector<8x32xf32>
    %327 = arith.mulf %321, %326 : vector<8x32xf32>
    %328 = arith.truncf %327 : vector<8x32xf32> to vector<8x32xbf16>
    %cst_43 = arith.constant dense<0.000000e+00> : vector<8x128xf32>
    %329 = tpu.matmul %328, %14, %cst_43 {dimension_numbers = #tpu.dot_dimension_numbers<[1], [0], [0], [1], [0, 0, 1, 1], [], []>} : vector<8x32xbf16>, vector<32x128xbf16>, vector<8x128xf32> -> vector<8x128xf32>
    %330 = arith.truncf %308 : vector<8x32xf32> to vector<8x32xbf16>
    %cst_44 = arith.constant dense<0.000000e+00> : vector<8x128xf32>
    %331 = tpu.matmul %330, %15, %cst_44 {dimension_numbers = #tpu.dot_dimension_numbers<[1], [0], [0], [1], [0, 0, 1, 1], [], []>} : vector<8x32xbf16>, vector<32x128xbf16>, vector<8x128xf32> -> vector<8x128xf32>
    %332 = arith.addf %329, %331 : vector<8x128xf32>
    %333 = vector.broadcast %16 : vector<1x128xf32> to vector<8x128xf32>
    %334 = arith.addf %332, %333 : vector<8x128xf32>
    %335 = math.tanh %334 : vector<8x128xf32>
    %336 = vector.broadcast %22 : vector<1x128xf32> to vector<8x128xf32>
    %337 = arith.mulf %335, %336 : vector<8x128xf32>
    %338 = vector.broadcast %27 : vector<1x128xf32> to vector<8x128xf32>
    %339 = arith.addf %337, %338 : vector<8x128xf32>
    %340 = vector.extract_strided_slice %339 {offsets = [0, 0], sizes = [8, 32], strides = [1, 1]} : vector<8x128xf32> to vector<8x32xf32>
    %341 = vector.extract_strided_slice %339 {offsets = [0, 32], sizes = [8, 32], strides = [1, 1]} : vector<8x128xf32> to vector<8x32xf32>
    %342 = vector.extract_strided_slice %339 {offsets = [0, 64], sizes = [8, 32], strides = [1, 1]} : vector<8x128xf32> to vector<8x32xf32>
    %343 = vector.extract_strided_slice %339 {offsets = [0, 96], sizes = [8, 32], strides = [1, 1]} : vector<8x128xf32> to vector<8x32xf32>
    %344 = arith.mulf %341, %306 : vector<8x32xf32>
    %345 = arith.mulf %340, %343 : vector<8x32xf32>
    %346 = arith.addf %344, %345 : vector<8x32xf32>
    %347 = math.tanh %346 : vector<8x32xf32>
    %348 = arith.mulf %342, %347 : vector<8x32xf32>
    %349 = arith.maximumf %309, %348 : vector<8x32xf32>
    %350 = arith.truncf %349 : vector<8x32xf32> to vector<8x32xbf16>
    %c0_45 = arith.constant 0 : index
    %c0_46 = arith.constant 0 : index
    %351 = vector.load %arg7[%c0_45, %c0_46] : memref<32x128xbf16, #tpu.memory_space<vmem>>, vector<32x128xbf16>
    %cst_47 = arith.constant dense<0.000000e+00> : vector<8x128xf32>
    %352 = tpu.matmul %350, %351, %cst_47 {dimension_numbers = #tpu.dot_dimension_numbers<[1], [0], [0], [1], [0, 0, 1, 1], [], []>} : vector<8x32xbf16>, vector<32x128xbf16>, vector<8x128xf32> -> vector<8x128xf32>
    %c0_48 = arith.constant 0 : index
    %c0_49 = arith.constant 0 : index
    %353 = vector.load %arg8[%c0_48, %c0_49] : memref<1x128xf32, #tpu.memory_space<vmem>>, vector<1x128xf32>
    %354 = vector.broadcast %353 : vector<1x128xf32> to vector<8x128xf32>
    %355 = arith.addf %352, %354 : vector<8x128xf32>
    %c0_50 = arith.constant 0 : index
    %c0_51 = arith.constant 0 : index
    %356 = vector.load %arg9[%c0_50, %c0_51] : memref<8x128xf32, #tpu.memory_space<vmem>>, vector<8x128xf32>
    tpu.vector_store %arg9[%c0_50, %c0_51], %355 {strides = array<i32>} : memref<8x128xf32, #tpu.memory_space<vmem>>, vector<8x128xf32>,
    return
  }
  func.func @transform_0(%arg0: i32) -> (i32, i32, i32) {
    %c0_i32 = arith.constant 0 : i32
    %c0_i32_0 = arith.constant 0 : i32
    %c0_i32_1 = arith.constant 0 : i32
    return %arg0, %c0_i32, %c0_i32_0 : i32, i32, i32
  }
  func.func @transform_1(%arg0: i32) -> (i32, i32) {
    %c0_i32 = arith.constant 0 : i32
    %c0_i32_0 = arith.constant 0 : i32
    %c0_i32_1 = arith.constant 0 : i32
    return %c0_i32, %c0_i32_0 : i32, i32
  }
  func.func @transform_2(%arg0: i32) -> (i32, i32) {
    %c0_i32 = arith.constant 0 : i32
    %c0_i32_0 = arith.constant 0 : i32
    %c0_i32_1 = arith.constant 0 : i32
    return %c0_i32, %c0_i32_0 : i32, i32
  }
  func.func @transform_3(%arg0: i32) -> (i32, i32) {
    %c0_i32 = arith.constant 0 : i32
    %c0_i32_0 = arith.constant 0 : i32
    %c0_i32_1 = arith.constant 0 : i32
    return %c0_i32, %c0_i32_0 : i32, i32
  }
  func.func @transform_4(%arg0: i32) -> (i32, i32) {
    %c0_i32 = arith.constant 0 : i32
    %c0_i32_0 = arith.constant 0 : i32
    %c0_i32_1 = arith.constant 0 : i32
    return %c0_i32, %c0_i32_0 : i32, i32
  }
  func.func @transform_5(%arg0: i32) -> (i32, i32) {
    %c0_i32 = arith.constant 0 : i32
    %c0_i32_0 = arith.constant 0 : i32
    %c0_i32_1 = arith.constant 0 : i32
    return %c0_i32, %c0_i32_0 : i32, i32
  }
  func.func @transform_6(%arg0: i32) -> (i32, i32) {
    %c0_i32 = arith.constant 0 : i32
    %c0_i32_0 = arith.constant 0 : i32
    %c0_i32_1 = arith.constant 0 : i32
    return %c0_i32, %c0_i32_0 : i32, i32
  }
  func.func @transform_7(%arg0: i32) -> (i32, i32) {
    %c0_i32 = arith.constant 0 : i32
    %c0_i32_0 = arith.constant 0 : i32
    %c0_i32_1 = arith.constant 0 : i32
    return %c0_i32, %c0_i32_0 : i32, i32
  }
  func.func @transform_8(%arg0: i32) -> (i32, i32) {
    %c0_i32 = arith.constant 0 : i32
    %c0_i32_0 = arith.constant 0 : i32
    return %arg0, %c0_i32 : i32, i32
  }
}

</mosaic_0001>

<bundles_post_ra>
// kernel: tpu_custom_call.1
= control target key start
LH: loop header
LB: loop body
LE: loop exit
PB: predicated region body
PF: predicated region fallthrough
CT: control target
= control target key end

     0   :  { %13 = vsyncpa [#allocation3], 0  ;;  %s3079_s0 = inlined_call_operand.hbm [shape: s32[1,8,8], index: 0, kind: input, shape index: {}]   ;;  %s3080_s1 = inlined_call_operand.hbm [shape: bf16[128,128], index: 1, kind: input, shape index: {}]   ;;  %s3081_s2 = inlined_call_operand.hbm [shape: bf16[32,128], index: 2, kind: input, shape index: {}]   ;;  %s3082_s3 = inlined_call_operand.hbm [shape: bf16[32,128], index: 3, kind: input, shape index: {}]   ;;  %s3083_s4 = inlined_call_operand.hbm [shape: bf16[32,128], index: 4, kind: input, shape index: {}]   ;;  %s3084_s5 = inlined_call_operand.vmem [shape: f32[1,128], index: 5, kind: input, shape index: {}]   ;;  %s3085_s6 = inlined_call_operand.vmem [shape: bf16[32,128], index: 6, kind: input, shape index: {}]   ;;  %s3086_s7 = inlined_call_operand.vmem [shape: f32[1,128], index: 7, kind: input, shape index: {}]   ;;  %s3087_s8 = inlined_call_operand.hbm [shape: f32[8,128], index: 8, kind: output, shape index: {}]  }
   0x1   :  { %14 = vsyncpa [#allocation6], 0 }
   0x2   :  { %15 = vsyncpa [#allocation9], 0 }
   0x3   :  { %16 = vsyncpa [#allocation4], 0  ;;  %s2488_s27 = smov [#allocation5]   ;;  %s2348_s9 = scalar_lea.hbm %s3080_s1, 1024 }
   0x4   :  { %s32_s28 = sshll.u32 %s2488_s27, 4  ;;  %p2349_p0 = scmp.ne.s32.totalorder %s3080_s1, %s2348_s9  ;;  %s33_s28 = int_to_ptr.vmem [resolvable:$true] %s32_s28 }
   0x5   :  { %p2352_p1 = scmp.lt.u32.totalorder %s2348_s9, %s3080_s1 }
   0x7   :  { %p2354_p2 = pnand %p2352_p1, %p2349_p0 }
   0x9   :  { %2357 = shalt.err (!%p2354_p2)
}
   0xa   :  { %s2358_s14 = scalar_lea.vmem %s33_s28, 1024  ;;  %p2363_p4 = scmp.lt.s32.totalorder %s33_s28, %s33_s28 }
   0xb   :  { %p2359_p3 = scmp.ne.s32.totalorder %s33_s28, %s2358_s14  ;;  %p2364_p5 = scmp.lt.s32.totalorder %s2358_s14, %s2358_s14 }
   0xd   :  { %p2365_p6 = por %p2364_p5, %p2363_p4 }
   0xf   :  { %p2366_p7 = pnand %p2365_p6, %p2359_p3 }
  0x11   :  { %2369 = shalt.err (!%p2366_p7)
}
  0x12   :  { %s2489_s15 = smov 64   ;;  %s2490_s16 = smov 4  }
  0x13   :  { %38 = dma.hbm_to_vmem [thread:$0]  %s3080_s1, 1024, %s33_s28, [#allocation6], %s2489_s15, %s2489_s15, %s2490_s16  }
  0x14   :  { %s2491_s19 = smov [#allocation8]   ;;  %s2492_s21 = smov [#allocation2]  }
  0x15   :  { %s56_s20 = sshll.u32 %s2491_s19, 4  ;;  %s23_s22 = sshll.u32 %s2492_s21, 4  ;;  %s57_s20 = int_to_ptr.vmem [resolvable:$true] %s56_s20  ;;  %s24_s22 = int_to_ptr.vmem [resolvable:$true] %s23_s22 }
  0x16   :  { %s2370_s25 = scalar_lea.hbm %s3082_s3, 256 }
  0x17   :  { %p2371_p8 = scmp.ne.s32.totalorder %s3082_s3, %s2370_s25  ;;  %p2374_p9 = scmp.lt.u32.totalorder %s2370_s25, %s3082_s3 }
  0x19   :  { %p2376_p10 = pnand %p2374_p9, %p2371_p8 }
  0x1b   :  { %2379 = shalt.err (!%p2376_p10)
}
  0x1c   :  { %s2380_s1 = scalar_lea.vmem %s57_s20, 256  ;;  %p2385_p12 = scmp.lt.s32.totalorder %s57_s20, %s57_s20 }
  0x1d   :  { %p2381_p11 = scmp.ne.s32.totalorder %s57_s20, %s2380_s1  ;;  %p2386_p13 = scmp.lt.s32.totalorder %s2380_s1, %s2380_s1 }
  0x1f   :  { %p2387_p0 = por %p2386_p13, %p2385_p12 }
  0x21   :  { %p2388_p1 = pnand %p2387_p0, %p2381_p11 }
  0x23   :  { %2391 = shalt.err (!%p2388_p1)
}
  0x24   :  { %62 = dma.hbm_to_vmem [thread:$0]  %s3082_s3, 256, %s57_s20, [#allocation9], %s2489_s15, %s2489_s15, %s2490_s16  }
  0x25   :  { %s2392_s12 = scalar_lea.hbm %s3079_s0, 128 }
  0x26   :  { %p2393_p2 = scmp.ne.s32.totalorder %s3079_s0, %s2392_s12  ;;  %p2396_p3 = scmp.lt.u32.totalorder %s2392_s12, %s3079_s0 }
  0x28   :  { %p2398_p4 = pnand %p2396_p3, %p2393_p2 }
  0x2a   :  { %2401 = shalt.err (!%p2398_p4)
}
  0x2b   :  { %s2402_s19 = scalar_lea.vmem %s24_s22, 128  ;;  %p2407_p6 = scmp.lt.s32.totalorder %s24_s22, %s24_s22 }
  0x2c   :  { %p2403_p5 = scmp.ne.s32.totalorder %s24_s22, %s2402_s19  ;;  %p2408_p7 = scmp.lt.s32.totalorder %s2402_s19, %s2402_s19 }
  0x2e   :  { %p2409_p8 = por %p2408_p7, %p2407_p6 }
  0x30   :  { %p2410_p9 = pnand %p2409_p8, %p2403_p5 }
  0x32   :  { %2413 = shalt.err (!%p2410_p9)
}
  0x33   :  { %26 = dma.hbm_to_vmem [thread:$0]  %s3079_s0, 128, %s24_s22, [#allocation3]  }
  0x34   :  { %s2493_s21 = smov [#allocation7]   ;;  %s2494_s24 = smov [#allocation10]  }
  0x35   :  { %s44_s23 = sshll.u32 %s2493_s21, 4  ;;  %s68_s25 = sshll.u32 %s2494_s24, 4  ;;  %s45_s23 = int_to_ptr.vmem [resolvable:$true] %s44_s23  ;;  %s69_s25 = int_to_ptr.vmem [resolvable:$true] %s68_s25 }
  0x36   :  { %s2414_s29 = scalar_lea.hbm %s3081_s2, 256 }
  0x37   :  { %p2415_p10 = scmp.ne.s32.totalorder %s3081_s2, %s2414_s29  ;;  %p2418_p11 = scmp.lt.u32.totalorder %s2414_s29, %s3081_s2 }
  0x39   :  { %p2420_p12 = pnand %p2418_p11, %p2415_p10 }
  0x3b   :  { %2423 = shalt.err (!%p2420_p12)
}
  0x3c   :  { %s2424_s0 = scalar_lea.vmem %s45_s23, 256  ;;  %p2429_p0 = scmp.lt.s32.totalorder %s45_s23, %s45_s23 }
  0x3d   :  { %p2425_p13 = scmp.ne.s32.totalorder %s45_s23, %s2424_s0  ;;  %p2430_p1 = scmp.lt.s32.totalorder %s2424_s0, %s2424_s0 }
  0x3f   :  { %p2431_p2 = por %p2430_p1, %p2429_p0 }
  0x41   :  { %p2432_p3 = pnand %p2431_p2, %p2425_p13 }
  0x43   :  { %2435 = shalt.err (!%p2432_p3)
}
  0x44   :  { %50 = dma.hbm_to_vmem [thread:$0]  %s3081_s2, 256, %s45_s23, [#allocation6], %s2489_s15, %s2489_s15, %s2490_s16  }
  0x45   :  { %s2436_s13 = scalar_lea.hbm %s3083_s4, 256 }
  0x46   :  { %p2437_p4 = scmp.ne.s32.totalorder %s3083_s4, %s2436_s13  ;;  %p2440_p5 = scmp.lt.u32.totalorder %s2436_s13, %s3083_s4 }
  0x48   :  { %p2442_p6 = pnand %p2440_p5, %p2437_p4 }
  0x4a   :  { %2445 = shalt.err (!%p2442_p6)
}
  0x4b   :  { %s2446_s3 = scalar_lea.vmem %s69_s25, 256  ;;  %p2451_p8 = scmp.lt.s32.totalorder %s69_s25, %s69_s25 }
  0x4c   :  { %p2447_p7 = scmp.ne.s32.totalorder %s69_s25, %s2446_s3  ;;  %p2452_p9 = scmp.lt.s32.totalorder %s2446_s3, %s2446_s3 }
  0x4e   :  { %p2453_p10 = por %p2452_p9, %p2451_p8 }
  0x50   :  { %p2454_p11 = pnand %p2453_p10, %p2447_p7 }
  0x52   :  { %2457 = shalt.err (!%p2454_p11)
}
  0x53   :  { %74 = dma.hbm_to_vmem [thread:$0]  %s3083_s4, 256, %s69_s25, [#allocation9], %s2489_s15, %s2489_s15, %s2490_s16  }
  0x54   :  { %2480 = dma.done.wait [#allocation3], 128  }
  0x55   :  { %2481 = vsyncadd [#allocation3], 4294967168 }
  0x56   :  { %2482 = dma.done.wait [#allocation6], 1280  }
  0x57   :  { %2483 = vsyncadd [#allocation6], 4294966016 }
  0x58   :  { %2484 = dma.done.wait [#allocation9], 512  }
  0x59   :  { %2485 = vsyncadd [#allocation9], 4294966784  ;;  %v98_v0 = vlaneseq  ;;  %v2495_v1 = vmov 0.0   ;;  %vm2496_vm0 = vmmov 0   ;;  %v2628_v7 = vld [vmem:[#allocation2] sm:$0xff]  ;;  %v2265_v10 = vld [vmem:[#allocation5] sm:$0xff]  }
  0x5a   :  { %2051 = vmatprep.subr.bf16.mxu1 %v2495_v1  ;;  %2055 = vmatprep.mubr.msk.bf16.mxu1 %vm2496_vm0, %v2495_v1  ;;  %v2266_v11 = vld [vmem:[#allocation5 + $0x8] sm:$0xff]   ;;  %v2267_v14 = vld [vmem:[#allocation5 + $0x10] sm:$0xff]   ;;  %v2634_v15 = vld [vmem:[#allocation7] sm:$0xff]   ;;  %v2497_v19 = vmov 0   ;;  %v2498_v28 = vmov 1.0|1.0  }
  0x5b   :  { %v2622_v2 = vshrl.u32 %v98_v0, 7  ;;  %2027 = vmatprep.subr.bf16.mxu0 %v2265_v10  ;;  %2052 = vmatpush3.bf16.msra.mxu1 %v2634_v15  ;;  %v2637_v16 = vld [vmem:[#allocation7 + $0x8] sm:$0xff]   ;;  %v2268_v17 = vld [vmem:[#allocation5 + $0x18] sm:$0xff]   ;;  %v2269_v18 = vld [vmem:[#allocation5 + $0x20] sm:$0xff]   ;;  %v2646_v25 = vand.u32 127, %v98_v0  ;;  %v2499_v38 = vmov 1.0  }
  0x5c   :  { %2028 = vmatpush3.bf16.msra.mxu0 %v2265_v10  ;;  %2053 = vmatprep.subr.bf16.mxu1 %v2495_v1  ;;  %v2270_v20 = vld [vmem:[#allocation5 + $0x28] sm:$0xff]   ;;  %v2272_v21 = vld [vmem:[#allocation5 + $0x30] sm:$0xff]   ;;  %v2274_v22 = vld [vmem:[#allocation5 + $0x38] sm:$0xff]   ;;  %s2500_s4 = smov 32   ;;  %vm361_vm8 = vcmask 261120  }
  0x5d   :  { %v116_v3 = vsub.s32 2, %v2622_v2  ;;  %v102_v4 = vsub.s32 0, %v2622_v2  ;;  %v123_v5 = vsub.s32 3, %v2622_v2  ;;  %v109_v6 = vsub.s32 1, %v2622_v2  ;;  %2029 = vmatprep.subr.bf16.mxu0 %v2266_v11  ;;  %v2673_v49 = vld [vmem:[#allocation10] sm:$0xff]   ;;  %v2675_v50 = vld [vmem:[#allocation8] sm:$0xff]  }
  0x5e   :  { %vm346_vm7 = vcmp.lt.s32.totalorder %v2646_v25, 96  ;;  %v2678_v51 = vld [vmem:[#allocation10 + $0x8] sm:$0xff]   ;;  %v2683_v52 = vld [vmem:[#allocation8 + $0x8] sm:$0xff]  }
  0x5f   :  { %v117_v8 = vrot.slane %v2628_v7, %v116_v3  ;;  %v103_v9 = vrot.slane %v2628_v7, %v102_v4  ;;  %v124_v12 = vrot.slane %v2628_v7, %v123_v5  ;;  %v110_v13 = vrot.slane %v2628_v7, %v109_v6  ;;  %2054 = vmatpush3.bf16.msra.mxu1 %v2637_v16  ;;  %v2715_v62 = vld [vmem:[%s3084_s5] ss:$0 sm:$0xff] }
  0x60   :  { %2030 = vmatpush3.bf16.msra.mxu0 %v2266_v11  ;;  %2059 = vmatprep.subr.bf16.mxu1 %v2495_v1  ;;  %v2661_v39 = vsel %vm346_vm7, 0.5, %v2499_v38  ;;  %v2664_v41 = vsel %vm346_vm7, 0.5, %v2495_v1  ;;  %v144_v38 = vsub.s32 6, %v2622_v2 }
  0x61   :  { %119 = vbcast.lane.b32.xlu1 %v117_v8, 256  ;;  %105 = vbcast.lane.b32.xlu0 %v103_v9, 256 }
  0x62   :  { %2031 = vmatprep.subr.bf16.mxu0 %v2267_v14  ;;  %2056 = vmatmul.mubr.bf16.vlgmr.msra.gmra.mrb[0].mxu1 %v2497_v19 }
  0x63   :  { %2063 = vmatprep.mubr.msk.bf16.mxu1 %vm2496_vm0, %v2495_v1  ;;  %2060 = vmatpush3.bf16.msra.mxu1 %v2673_v49 }
  0x64   :  { %2032 = vmatpush3.bf16.msra.mxu0 %v2267_v14  ;;  %2061 = vmatprep.subr.bf16.mxu1 %v2495_v1 }
  0x65   :  { %126 = vbcast.lane.b32.xlu1 %v124_v12, 256  ;;  %112 = vbcast.lane.b32.xlu0 %v110_v13, 256 }
  0x66   :  { %2033 = vmatprep.subr.bf16.mxu0 %v2268_v17 }
  0x67   :  { %2062 = vmatpush3.bf16.msra.mxu1 %v2678_v51 }
  0x68   :  { %2034 = vmatpush3.bf16.msra.mxu0 %v2268_v17  ;;  %2067 = vmatprep.subr.bf16.mxu1 %v2495_v1 }
  0x69   :  { %2035 = vmatprep.subr.bf16.mxu0 %v2269_v18 }
  0x6a   :  { %2064 = vmatmul.mubr.bf16.vlgmr.msra.gmra.mrb[4].mxu1 %v2497_v19 }
  0x6b   :  { %2068 = vmatpush3.bf16.msra.mxu1 %v2675_v50  ;;  %2071 = vmatprep.mubr.msk.bf16.mxu1 %vm2496_vm0, %v2495_v1 }
  0x6c   :  { %2036 = vmatpush3.bf16.msra.mxu0 %v2269_v18  ;;  %2069 = vmatprep.subr.bf16.mxu1 %v2495_v1 }
  0x6d   :  { %2037 = vmatprep.subr.bf16.mxu0 %v2270_v20 }
  0x6f   :  { %2070 = vmatpush3.bf16.msra.mxu1 %v2683_v52 }
  0x70   :  { %2038 = vmatpush3.bf16.msra.mxu0 %v2270_v20  ;;  %2075 = vmatprep.subr.bf16.mxu1 %v2495_v1 }
  0x71   :  { %2039 = vmatprep.subr.bf16.mxu0 %v2272_v21 }
  0x74   :  { %2040 = vmatpush3.bf16.msra.mxu0 %v2272_v21 }
  0x75   :  { %2041 = vmatprep.subr.bf16.mxu0 %v2274_v22 }
  0x78   :  { %2042 = vmatpush3.bf16.msra.mxu0 %v2274_v22 }
  0x79   :  { %2091 = vmatprep.subr.bf16.mxu0 %v2495_v1 }
  0xd3   :  { %v120_v23 = vpop.permute.xlu1 %119  ;;  %v106_v24 = vpop.permute.xlu0 %105 }
  0xd4   :  { %vm158_vm1 = vcmp.eq.s32.totalorder %v120_v23, %v2646_v25  ;;  %vm156_vm4 = vcmp.eq.s32.totalorder %v106_v24, %v2646_v25 }
  0xd7   :  { %v127_v26 = vpop.permute.xlu1 %126  ;;  %v113_v27 = vpop.permute.xlu0 %112 }
  0xd8   :  { %vm159_vm2 = vcmp.eq.s32.totalorder %v127_v26, %v2646_v25  ;;  %vm157_vm3 = vcmp.eq.s32.totalorder %v113_v27, %v2646_v25 }
  0xd9   :  { %vm1934_vm5 = vmpackc.low %vm159_vm2, %vm158_vm1 }
  0xda   :  { %vm1932_vm6 = vmpackc.low %vm157_vm3, %vm156_vm4 }
  0xdb   :  { %2043 = vmatprep.mubr.msk.bf16.mxu0 %vm1932_vm6, %v2498_v28 }
  0xdc   :  { %2044 = vmatmul.mubr.msk.bf16.vlgmr.msra.gmra.mrb[0].mxu0 %vm1934_vm5, %v2498_v28 }
  0xdd   :  { %2092 = vmatpush3.bf16.msra.mxu0 %v2675_v50 }
  0xde   :  { %2093 = vmatprep.subr.bf16.mxu0 %v2495_v1 }
  0xe1   :  { %2094 = vmatpush3.bf16.msra.mxu0 %v2683_v52 }
  0xe2   :  { %2107 = vmatprep.subr.bf16.mxu0 %v2495_v1 }
 0x135   :  { %v399_v29 = vpop.f32.mrb[0].mxu1 }
 0x136   :  { %v2057_v30 = vpop.f32.mrb[1].mxu1 }
 0x137   :  { %v402_v31 = vpop.f32.mrb[2].mxu1 }
 0x138   :  { %v2058_v32 = vpop.f32.mrb[3].mxu1 }
 0x13d   :  { %v472_v57 = vpop.f32.mrb[4].mxu1 }
 0x13e   :  { %v2065_v58 = vpop.f32.mrb[5].mxu1 }
 0x13f   :  { %v475_v59 = vpop.f32.mrb[6].mxu1 }
 0x140   :  { %v2066_v60 = vpop.f32.mrb[7].mxu1 }
 0x1af   :  { %v2654_v33 = vpop.f32.mrb[0].mxu0 }
 0x1b0   :  { %v302_v34 = vpop.f32.mrb[1].mxu0 }
 0x1b1   :  { %v400_v35 = vadd.f32 %v399_v29, %v302_v34  ;;  %v2656_v36 = vpop.f32.mrb[2].mxu0  ;;  %v130_v34 = vsub.s32 4, %v2622_v2 }
 0x1b2   :  { %v2658_v37 = vpop.f32.mrb[3].mxu0 }
 0x1b3   :  { %2281 = vtanh.f32 %v400_v35 }
 0x1bd   :  { %v2282_v40 = vpop.eup %2281 }
 0x1be   :  { %v406_v42 = vmul.f32 %v2282_v40, %v2661_v39  ;;  %v137_v40 = vsub.s32 5, %v2622_v2 }
 0x1c0   :  { %v407_v43 = vadd.f32 %v406_v42, %v2664_v41  ;;  %v145_v42 = vrot.slane %v2628_v7, %v144_v38 }
 0x1c2   :  { %410 = vrot.lane.b32.xlu0 %v407_v43, %s2500_s4  ;;  %v408_v46 = vmul.f32 0.0, %v407_v43 }
 0x234   :  { %v411_v44 = vpop.permute.xlu0 %410 }
 0x235   :  { %v413_v45 = vmul.f32 %v411_v44, %v407_v43  ;;  %v138_v44 = vrot.slane %v2628_v7, %v137_v40 }
 0x237   :  { %415 = vrot.lane.b32.xlu1 %v413_v45, %s2500_s4  ;;  %v151_v45 = vsub.s32 7, %v2622_v2 }
 0x2a9   :  { %v416_v47 = vpop.permute.xlu1 %415 }
 0x2aa   :  { %v2670_v48 = vadd.f32 %v416_v47, %v408_v46  ;;  %v152_v46 = vrot.slane %v2628_v7, %v151_v45 }
 0x2ac   :  { %2283 = vtanh.f32 %v2670_v48 }
 0x2b6   :  { %v2284_v53 = vpop.eup %2283 }
 0x2b7   :  { %421 = vrot.lane.b32.xlu0 %v2284_v53, %s2500_s4 }
 0x329   :  { %v422_v54 = vpop.permute.xlu0 %421 }
 0x32a   :  { %v424_v55 = vmul.f32 %v422_v54, %v407_v43 }
 0x32c   :  { %v425_v56 = vpack.c.bf16 %v424_v55, %v424_v55 }
 0x32e   :  { %479 = vrot.lane.b32.xlu1 %v425_v56, %s2489_s15 }
 0x3a0   :  { %v480_v61 = vpop.permute.xlu1 %479 }
 0x3a1   :  { %2072 = vmatmul.mubr.msk.bf16.vlgmr.msra.gmra.mrb[8].mxu1 %vm361_vm8, %v480_v61 }
 0x3a2   :  { %2076 = vmatpush3.bf16.msra.mxu1 %v2634_v15  ;;  %2079 = vmatprep.mubr.msk.bf16.mxu1 %vm2496_vm0, %v2495_v1 }
 0x3a3   :  { %2077 = vmatprep.subr.bf16.mxu1 %v2495_v1 }
 0x3a6   :  { %2078 = vmatpush3.bf16.msra.mxu1 %v2637_v16 }
 0x3a7   :  { %2083 = vmatprep.subr.bf16.mxu1 %v2495_v1 }
 0x3a9   :  { %2080 = vmatmul.mubr.msk.bf16.vlgmr.msra.gmra.mrb[12].mxu1 %vm361_vm8, %v480_v61 }
 0x3aa   :  { %2084 = vmatpush3.bf16.msra.mxu1 %v2673_v49  ;;  %2087 = vmatprep.mubr.msk.bf16.mxu1 %vm2496_vm0, %v2495_v1 }
 0x3ab   :  { %2085 = vmatprep.subr.bf16.mxu1 %v2495_v1 }
 0x3ae   :  { %2086 = vmatpush3.bf16.msra.mxu1 %v2678_v51 }
 0x3af   :  { %2099 = vmatprep.subr.bf16.mxu1 %v2495_v1 }
 0x474   :  { %v530_v63 = vpop.f32.mrb[8].mxu1 }
 0x475   :  { %v531_v0 = vadd.f32 %v530_v63, %v472_v57  ;;  %v2073_v3 = vpop.f32.mrb[9].mxu1 }
 0x476   :  { %v533_v4 = vpop.f32.mrb[10].mxu1 }
 0x477   :  { %v542_v5 = vadd.f32 %v2715_v62, %v531_v0  ;;  %v2074_v6 = vpop.f32.mrb[11].mxu1 }
 0x479   :  { %2285 = vtanh.f32 %v542_v5 }
 0x47c   :  { %v597_v8 = vpop.f32.mrb[12].mxu1 }
 0x47d   :  { %v598_v9 = vadd.f32 %v597_v8, %v2658_v37  ;;  %v2081_v10 = vpop.f32.mrb[13].mxu1  ;;  %v131_v37 = vrot.slane %v2628_v7, %v130_v34 }
 0x47e   :  { %v600_v11 = vpop.f32.mrb[14].mxu1 }
 0x47f   :  { %2287 = vtanh.f32 %v598_v9  ;;  %v2082_v12 = vpop.f32.mrb[15].mxu1 }
 0x483   :  { %v2286_v13 = vpop.eup %2285 }
 0x484   :  { %v544_v14 = vmul.f32 %v2286_v13, %v2661_v39 }
 0x486   :  { %v545_v17 = vadd.f32 %v544_v14, %v2664_v41 }
 0x488   :  { %548 = vrot.lane.b32.xlu0 %v545_v17, %s2500_s4  ;;  %v546_v26 = vmul.f32 0.0, %v545_v17 }
 0x489   :  { %v2288_v18 = vpop.eup %2287 }
 0x48a   :  { %v604_v19 = vmul.f32 %v2288_v18, %v2661_v39 }
 0x48c   :  { %v605_v20 = vadd.f32 %v604_v19, %v2664_v41 }
 0x48e   :  { %608 = vrot.lane.b32.xlu1 %v605_v20, %s2500_s4  ;;  %v606_v30 = vmul.f32 %v605_v20, %v2670_v48 }
 0x4fa   :  { %v549_v21 = vpop.permute.xlu0 %548 }
 0x4fb   :  { %v551_v22 = vmul.f32 %v549_v21, %v545_v17 }
 0x4fd   :  { %553 = vrot.lane.b32.xlu0 %v551_v22, %s2500_s4 }
 0x500   :  { %v609_v23 = vpop.permute.xlu1 %608 }
 0x501   :  { %v611_v24 = vmul.f32 %v609_v23, %v605_v20 }
 0x503   :  { %613 = vrot.lane.b32.xlu1 %v611_v24, %s2500_s4 }
 0x56f   :  { %v554_v27 = vpop.permute.xlu0 %553 }
 0x570   :  { %v2727_v29 = vadd.f32 %v554_v27, %v546_v26 }
 0x572   :  { %2289 = vtanh.f32 %v2727_v29 }
 0x575   :  { %v614_v31 = vpop.permute.xlu1 %613 }
 0x576   :  { %v2731_v32 = vadd.f32 %v614_v31, %v606_v30 }
 0x578   :  { %2291 = vtanh.f32 %v2731_v32 }
 0x57c   :  { %v2290_v35 = vpop.eup %2289 }
 0x57d   :  { %559 = vrot.lane.b32.xlu0 %v2290_v35, %s2500_s4 }
 0x581   :  { %133 = vbcast.lane.b32.xlu0 %v131_v37, 256 }
 0x582   :  { %v2292_v43 = vpop.eup %2291 }
 0x583   :  { %619 = vrot.lane.b32.xlu1 %v2292_v43, %s2500_s4 }
 0x585   :  { %147 = vbcast.lane.b32.xlu0 %v145_v42, 256 }
 0x587   :  { %140 = vbcast.lane.b32.xlu1 %v138_v44, 256 }
 0x58b   :  { %154 = vbcast.lane.b32.xlu1 %v152_v46, 256 }
 0x5ef   :  { %v560_v47 = vpop.permute.xlu0 %559 }
 0x5f0   :  { %v2744_v48 = vmul.f32 %v560_v47, %v545_v17 }
 0x5f2   :  { %v624_v53 = vpack.c.bf16 %v2744_v48, %v2744_v48 }
 0x5f3   :  { %v134_v54 = vpop.permute.xlu0 %133 }
 0x5f4   :  { %626 = vrot.lane.b32.xlu0 %v624_v53, %s2489_s15  ;;  %vm160_vm9 = vcmp.eq.s32.totalorder %v134_v54, %v2646_v25 }
 0x5f5   :  { %v620_v55 = vpop.permute.xlu1 %619 }
 0x5f6   :  { %v622_v56 = vmul.f32 %v620_v55, %v605_v20 }
 0x5f7   :  { %v148_v58 = vpop.permute.xlu0 %147 }
 0x5f8   :  { %v623_v57 = vpack.c.bf16 %v622_v56, %v622_v56  ;;  %vm162_vm12 = vcmp.eq.s32.totalorder %v148_v58, %v2646_v25 }
 0x5f9   :  { %v141_v2 = vpop.permute.xlu1 %140 }
 0x5fa   :  { %672 = vrot.lane.b32.xlu1 %v623_v57, %s2489_s15  ;;  %vm161_vm10 = vcmp.eq.s32.totalorder %v141_v2, %v2646_v25 }
 0x5fb   :  { %vm1936_vm11 = vmpackc.low %vm161_vm10, %vm160_vm9 }
 0x5fc   :  { %2047 = vmatprep.mubr.msk.bf16.mxu0 %vm1936_vm11, %v2498_v28 }
 0x5fd   :  { %v155_v7 = vpop.permute.xlu1 %154 }
 0x5fe   :  { %vm163_vm13 = vcmp.eq.s32.totalorder %v155_v7, %v2646_v25 }
 0x5ff   :  { %vm1938_vm14 = vmpackc.low %vm163_vm13, %vm162_vm12 }
 0x600   :  { %2048 = vmatmul.mubr.msk.bf16.gmra.mrb[4].mxu0 %vm1938_vm14, %v2498_v28 }
 0x601   :  { %2095 = vmatprep.mubr.msk.bf16.mxu0 %vm2496_vm0, %v2495_v1 }
 0x666   :  { %v627_v59 = vpop.permute.xlu0 %626 }
 0x667   :  { %2088 = vmatmul.mubr.msk.bf16.vlgmr.msra.gmra.mrb[16].mxu1 %vm361_vm8, %v627_v59 }
 0x668   :  { %2100 = vmatpush3.bf16.msra.mxu1 %v2634_v15  ;;  %2103 = vmatprep.mubr.msk.bf16.mxu1 %vm2496_vm0, %v2495_v1 }
 0x669   :  { %2101 = vmatprep.subr.bf16.mxu1 %v2495_v1 }
 0x66c   :  { %2102 = vmatpush3.bf16.msra.mxu1 %v2637_v16  ;;  %v673_v60 = vpop.permute.xlu1 %672 }
 0x66d   :  { %2096 = vmatmul.mubr.msk.bf16.vlgmr.msra.gmra.mrb[8].mxu0 %vm361_vm8, %v673_v60  ;;  %2115 = vmatprep.subr.bf16.mxu1 %v2495_v1 }
 0x66e   :  { %2108 = vmatpush3.bf16.msra.mxu0 %v2673_v49  ;;  %2111 = vmatprep.mubr.msk.bf16.mxu0 %vm2496_vm0, %v2495_v1 }
 0x66f   :  { %2104 = vmatmul.mubr.msk.bf16.vlgmr.msra.gmra.mrb[20].mxu1 %vm361_vm8, %v673_v60  ;;  %2109 = vmatprep.subr.bf16.mxu0 %v2495_v1 }
 0x670   :  { %2116 = vmatpush3.bf16.msra.mxu1 %v2675_v50  ;;  %2119 = vmatprep.mubr.msk.bf16.mxu1 %vm2496_vm0, %v2495_v1 }
 0x671   :  { %2117 = vmatprep.subr.bf16.mxu1 %v2495_v1 }
 0x672   :  { %2110 = vmatpush3.bf16.msra.mxu0 %v2678_v51 }
 0x673   :  { %2123 = vmatprep.subr.bf16.mxu0 %v2495_v1 }
 0x674   :  { %2118 = vmatpush3.bf16.msra.mxu1 %v2683_v52 }
 0x675   :  { %2131 = vmatprep.subr.bf16.mxu1 %v2495_v1 }
 0x6d3   :  { %v2779_v25 = vpop.f32.mrb[4].mxu0 }
 0x6d4   :  { %v2781_v28 = vpop.f32.mrb[5].mxu0 }
 0x6d5   :  { %v2783_v61 = vpop.f32.mrb[6].mxu0 }
 0x6d6   :  { %v2785_v63 = vpop.f32.mrb[7].mxu0 }
 0x73a   :  { %v665_v0 = vpop.f32.mrb[16].mxu1 }
 0x73b   :  { %v2089_v3 = vpop.f32.mrb[17].mxu1 }
 0x73c   :  { %v668_v4 = vpop.f32.mrb[18].mxu1 }
 0x73d   :  { %v2090_v5 = vpop.f32.mrb[19].mxu1 }
 0x740   :  { %v711_v6 = vpop.f32.mrb[8].mxu0 }
 0x741   :  { %v712_v8 = vadd.f32 %v711_v6, %v665_v0  ;;  %v2097_v9 = vpop.f32.mrb[9].mxu0 }
 0x742   :  { %v714_v10 = vpop.f32.mrb[10].mxu0  ;;  %v773_v11 = vpop.f32.mrb[20].mxu1 }
 0x743   :  { %v717_v12 = vadd.f32 %v2715_v62, %v712_v8  ;;  %v774_v13 = vadd.f32 %v2654_v33, %v773_v11  ;;  %v2098_v14 = vpop.f32.mrb[11].mxu0  ;;  %v2105_v17 = vpop.f32.mrb[21].mxu1 }
 0x744   :  { %v776_v18 = vpop.f32.mrb[22].mxu1 }
 0x745   :  { %2293 = vtanh.f32 %v717_v12  ;;  %v2106_v19 = vpop.f32.mrb[23].mxu1 }
 0x746   :  { %2295 = vtanh.f32 %v774_v13 }
 0x74f   :  { %v2294_v20 = vpop.eup %2293 }
 0x750   :  { %v2296_v21 = vpop.eup %2295  ;;  %v719_v22 = vmul.f32 %v2294_v20, %v2661_v39 }
 0x751   :  { %v780_v23 = vmul.f32 %v2296_v21, %v2661_v39 }
 0x752   :  { %v720_v24 = vadd.f32 %v719_v22, %v2664_v41 }
 0x753   :  { %v781_v26 = vadd.f32 %v780_v23, %v2664_v41 }
 0x754   :  { %723 = vrot.lane.b32.xlu0 %v720_v24, %s2500_s4  ;;  %v721_v34 = vmul.f32 %v720_v24, %v2727_v29 }
 0x755   :  { %784 = vrot.lane.b32.xlu1 %v781_v26, %s2500_s4  ;;  %v782_v35 = vmul.f32 %v781_v26, %v2731_v32 }
 0x7c6   :  { %v724_v33 = vpop.permute.xlu0 %723 }
 0x7c7   :  { %v785_v27 = vpop.permute.xlu1 %784  ;;  %v726_v30 = vmul.f32 %v724_v33, %v720_v24 }
 0x7c8   :  { %v787_v31 = vmul.f32 %v785_v27, %v781_v26 }
 0x7c9   :  { %728 = vrot.lane.b32.xlu0 %v726_v30, %s2500_s4 }
 0x7ca   :  { %789 = vrot.lane.b32.xlu1 %v787_v31, %s2500_s4 }
 0x83b   :  { %v729_v37 = vpop.permute.xlu0 %728 }
 0x83c   :  { %v790_v38 = vpop.permute.xlu1 %789  ;;  %v2799_v40 = vadd.f32 %v729_v37, %v721_v34 }
 0x83d   :  { %v2801_v42 = vadd.f32 %v790_v38, %v782_v35 }
 0x83e   :  { %2297 = vtanh.f32 %v2799_v40 }
 0x83f   :  { %2299 = vtanh.f32 %v2801_v42 }
 0x848   :  { %v2298_v43 = vpop.eup %2297 }
 0x849   :  { %v2300_v44 = vpop.eup %2299  ;;  %734 = vrot.lane.b32.xlu0 %v2298_v43, %s2500_s4 }
 0x84a   :  { %795 = vrot.lane.b32.xlu1 %v2300_v44, %s2500_s4 }
 0x8bb   :  { %v735_v45 = vpop.permute.xlu0 %734 }
 0x8bc   :  { %v796_v29 = vpop.permute.xlu1 %795  ;;  %v2807_v46 = vmul.f32 %v735_v45, %v720_v24 }
 0x8bd   :  { %v798_v32 = vmul.f32 %v796_v29, %v781_v26 }
 0x8be   :  { %v800_v47 = vpack.c.bf16 %v2807_v46, %v2807_v46  ;;  %v738_v35 = vmax.f32 %v2744_v48, %v2807_v46 }
 0x8bf   :  { %v799_v53 = vpack.c.bf16 %v798_v32, %v798_v32 }
 0x8c0   :  { %802 = vrot.lane.b32.xlu0 %v800_v47, %s2489_s15 }
 0x8c1   :  { %848 = vrot.lane.b32.xlu1 %v799_v53, %s2489_s15 }
 0x932   :  { %v803_v54 = vpop.permute.xlu0 %802 }
 0x933   :  { %v849_v55 = vpop.permute.xlu1 %848  ;;  %2112 = vmatmul.mubr.msk.bf16.vlgmr.msra.gmra.mrb[12].mxu0 %vm361_vm8, %v803_v54 }
 0x934   :  { %2120 = vmatmul.mubr.msk.bf16.vlgmr.msra.gmra.mrb[24].mxu1 %vm361_vm8, %v849_v55  ;;  %2124 = vmatpush3.bf16.msra.mxu0 %v2634_v15 }
 0x935   :  { %2125 = vmatprep.subr.bf16.mxu0 %v2495_v1  ;;  %2127 = vmatprep.mubr.msk.bf16.mxu0 %vm2496_vm0, %v2495_v1 }
 0x936   :  { %2132 = vmatpush3.bf16.msra.mxu1 %v2673_v49  ;;  %2135 = vmatprep.mubr.msk.bf16.mxu1 %vm2496_vm0, %v2495_v1 }
 0x937   :  { %2133 = vmatprep.subr.bf16.mxu1 %v2495_v1 }
 0x938   :  { %2126 = vmatpush3.bf16.msra.mxu0 %v2637_v16 }
 0x939   :  { %2139 = vmatprep.subr.bf16.mxu0 %v2495_v1 }
 0x93a   :  { %2134 = vmatpush3.bf16.msra.mxu1 %v2678_v51 }
 0x93b   :  { %2128 = vmatmul.mubr.msk.bf16.vlgmr.msra.gmra.mrb[16].mxu0 %vm361_vm8, %v849_v55  ;;  %2147 = vmatprep.subr.bf16.mxu1 %v2495_v1 }
 0x93c   :  { %2140 = vmatpush3.bf16.msra.mxu0 %v2675_v50  ;;  %2143 = vmatprep.mubr.msk.bf16.mxu0 %vm2496_vm0, %v2495_v1 }
 0x93d   :  { %2141 = vmatprep.subr.bf16.mxu0 %v2495_v1 }
 0x940   :  { %2142 = vmatpush3.bf16.msra.mxu0 %v2683_v52 }
 0x941   :  { %2155 = vmatprep.subr.bf16.mxu0 %v2495_v1 }
 0xa06   :  { %v841_v56 = vpop.f32.mrb[12].mxu0 }
 0xa07   :  { %v887_v57 = vpop.f32.mrb[24].mxu1  ;;  %v2113_v2 = vpop.f32.mrb[13].mxu0 }
 0xa08   :  { %v888_v58 = vadd.f32 %v887_v57, %v841_v56  ;;  %v2121_v7 = vpop.f32.mrb[25].mxu1  ;;  %v844_v59 = vpop.f32.mrb[14].mxu0 }
 0xa09   :  { %v890_v60 = vpop.f32.mrb[26].mxu1  ;;  %v2114_v0 = vpop.f32.mrb[15].mxu0 }
 0xa0a   :  { %v893_v3 = vadd.f32 %v2715_v62, %v888_v58  ;;  %v2122_v4 = vpop.f32.mrb[27].mxu1 }
 0xa0c   :  { %2301 = vtanh.f32 %v893_v3 }
 0xa0e   :  { %v949_v5 = vpop.f32.mrb[16].mxu0 }
 0xa0f   :  { %v950_v6 = vadd.f32 %v2656_v36, %v949_v5  ;;  %v2129_v8 = vpop.f32.mrb[17].mxu0 }
 0xa10   :  { %v952_v9 = vpop.f32.mrb[18].mxu0 }
 0xa11   :  { %2303 = vtanh.f32 %v950_v6  ;;  %v2130_v10 = vpop.f32.mrb[19].mxu0 }
 0xa16   :  { %v2302_v11 = vpop.eup %2301 }
 0xa17   :  { %v895_v12 = vmul.f32 %v2302_v11, %v2661_v39 }
 0xa19   :  { %v896_v13 = vadd.f32 %v895_v12, %v2664_v41 }
 0xa1b   :  { %v2304_v14 = vpop.eup %2303  ;;  %899 = vrot.lane.b32.xlu0 %v896_v13, %s2500_s4  ;;  %v897_v22 = vmul.f32 %v896_v13, %v2799_v40 }
 0xa1c   :  { %v956_v17 = vmul.f32 %v2304_v14, %v2661_v39 }
 0xa1e   :  { %v957_v18 = vadd.f32 %v956_v17, %v2664_v41 }
 0xa20   :  { %960 = vrot.lane.b32.xlu1 %v957_v18, %s2500_s4  ;;  %v958_v26 = vmul.f32 %v957_v18, %v2801_v42 }
 0xa8d   :  { %v900_v19 = vpop.permute.xlu0 %899 }
 0xa8e   :  { %v902_v36 = vmul.f32 %v900_v19, %v896_v13 }
 0xa90   :  { %904 = vrot.lane.b32.xlu0 %v902_v36, %s2500_s4 }
 0xa92   :  { %v961_v20 = vpop.permute.xlu1 %960 }
 0xa93   :  { %v963_v21 = vmul.f32 %v961_v20, %v957_v18 }
 0xa95   :  { %965 = vrot.lane.b32.xlu1 %v963_v21, %s2500_s4 }
 0xb02   :  { %v905_v23 = vpop.permute.xlu0 %904 }
 0xb03   :  { %v2845_v24 = vadd.f32 %v905_v23, %v897_v22 }
 0xb05   :  { %2305 = vtanh.f32 %v2845_v24 }
 0xb07   :  { %v966_v33 = vpop.permute.xlu1 %965 }
 0xb08   :  { %v2849_v27 = vadd.f32 %v966_v33, %v958_v26 }
 0xb0a   :  { %2307 = vtanh.f32 %v2849_v27 }
 0xb0f   :  { %v2306_v30 = vpop.eup %2305 }
 0xb10   :  { %910 = vrot.lane.b32.xlu0 %v2306_v30, %s2500_s4 }
 0xb14   :  { %v2308_v31 = vpop.eup %2307 }
 0xb15   :  { %971 = vrot.lane.b32.xlu1 %v2308_v31, %s2500_s4 }
 0xb82   :  { %v911_v34 = vpop.permute.xlu0 %910 }
 0xb83   :  { %v913_v37 = vmul.f32 %v911_v34, %v896_v13 }
 0xb85   :  { %v2856_v38 = vmax.f32 %v738_v35, %v913_v37  ;;  %v976_v40 = vpack.c.bf16 %v913_v37, %v913_v37 }
 0xb87   :  { %978 = vrot.lane.b32.xlu0 %v976_v40, %s2489_s15  ;;  %v972_v42 = vpop.permute.xlu1 %971 }
 0xb88   :  { %v974_v43 = vmul.f32 %v972_v42, %v957_v18 }
 0xb8a   :  { %v975_v44 = vpack.c.bf16 %v974_v43, %v974_v43 }
 0xb8c   :  { %1024 = vrot.lane.b32.xlu1 %v975_v44, %s2489_s15 }
 0xbf9   :  { %v979_v45 = vpop.permute.xlu0 %978 }
 0xbfa   :  { %2136 = vmatmul.mubr.msk.bf16.vlgmr.msra.gmra.mrb[28].mxu1 %vm361_vm8, %v979_v45 }
 0xbfb   :  { %2148 = vmatpush3.bf16.msra.mxu1 %v2634_v15  ;;  %2151 = vmatprep.mubr.msk.bf16.mxu1 %vm2496_vm0, %v2495_v1 }
 0xbfc   :  { %2149 = vmatprep.subr.bf16.mxu1 %v2495_v1 }
 0xbfe   :  { %v1025_v48 = vpop.permute.xlu1 %1024 }
 0xbff   :  { %2150 = vmatpush3.bf16.msra.mxu1 %v2637_v16  ;;  %2144 = vmatmul.mubr.msk.bf16.vlgmr.msra.gmra.mrb[20].mxu0 %vm361_vm8, %v1025_v48 }
 0xc00   :  { %2156 = vmatpush3.bf16.msra.mxu0 %v2673_v49  ;;  %2163 = vmatprep.subr.bf16.mxu1 %v2495_v1 }
 0xc01   :  { %2157 = vmatprep.subr.bf16.mxu0 %v2495_v1  ;;  %2159 = vmatprep.mubr.msk.bf16.mxu0 %vm2496_vm0, %v2495_v1 }
 0xc02   :  { %2152 = vmatmul.mubr.msk.bf16.vlgmr.msra.gmra.mrb[32].mxu1 %vm361_vm8, %v1025_v48 }
 0xc03   :  { %2164 = vmatpush3.bf16.msra.mxu1 %v2675_v50  ;;  %2167 = vmatprep.mubr.msk.bf16.mxu1 %vm2496_vm0, %v2495_v1 }
 0xc04   :  { %2158 = vmatpush3.bf16.msra.mxu0 %v2678_v51  ;;  %2165 = vmatprep.subr.bf16.mxu1 %v2495_v1 }
 0xc05   :  { %2171 = vmatprep.subr.bf16.mxu0 %v2495_v1 }
 0xc07   :  { %2166 = vmatpush3.bf16.msra.mxu1 %v2683_v52 }
 0xc08   :  { %2179 = vmatprep.subr.bf16.mxu1 %v2495_v1 }
 0xccd   :  { %v1017_v29 = vpop.f32.mrb[28].mxu1 }
 0xcce   :  { %v2137_v46 = vpop.f32.mrb[29].mxu1 }
 0xccf   :  { %v1020_v32 = vpop.f32.mrb[30].mxu1 }
 0xcd0   :  { %v2138_v47 = vpop.f32.mrb[31].mxu1 }
 0xcd2   :  { %v1063_v53 = vpop.f32.mrb[20].mxu0 }
 0xcd3   :  { %v1064_v54 = vadd.f32 %v1063_v53, %v1017_v29  ;;  %v2145_v55 = vpop.f32.mrb[21].mxu0 }
 0xcd4   :  { %v1066_v56 = vpop.f32.mrb[22].mxu0 }
 0xcd5   :  { %v1069_v57 = vadd.f32 %v2715_v62, %v1064_v54  ;;  %v1125_v2 = vpop.f32.mrb[32].mxu1  ;;  %v2146_v58 = vpop.f32.mrb[23].mxu0 }
 0xcd6   :  { %v1126_v7 = vadd.f32 %v1125_v2, %v2781_v28  ;;  %v2153_v59 = vpop.f32.mrb[33].mxu1 }
 0xcd7   :  { %2309 = vtanh.f32 %v1069_v57  ;;  %v1128_v60 = vpop.f32.mrb[34].mxu1 }
 0xcd8   :  { %2311 = vtanh.f32 %v1126_v7  ;;  %v2154_v0 = vpop.f32.mrb[35].mxu1 }
 0xce1   :  { %v2310_v3 = vpop.eup %2309 }
 0xce2   :  { %v2312_v4 = vpop.eup %2311  ;;  %v1071_v5 = vmul.f32 %v2310_v3, %v2661_v39 }
 0xce3   :  { %v1132_v6 = vmul.f32 %v2312_v4, %v2661_v39 }
 0xce4   :  { %v1072_v8 = vadd.f32 %v1071_v5, %v2664_v41 }
 0xce5   :  { %v1133_v9 = vadd.f32 %v1132_v6, %v2664_v41 }
 0xce6   :  { %1075 = vrot.lane.b32.xlu0 %v1072_v8, %s2500_s4  ;;  %v1073_v13 = vmul.f32 %v1072_v8, %v2845_v24 }
 0xce7   :  { %1136 = vrot.lane.b32.xlu1 %v1133_v9, %s2500_s4  ;;  %v1134_v14 = vmul.f32 %v1133_v9, %v2849_v27 }
 0xd58   :  { %v1076_v28 = vpop.permute.xlu0 %1075 }
 0xd59   :  { %v1137_v10 = vpop.permute.xlu1 %1136  ;;  %v1078_v11 = vmul.f32 %v1076_v28, %v1072_v8 }
 0xd5a   :  { %v1139_v12 = vmul.f32 %v1137_v10, %v1133_v9 }
 0xd5b   :  { %1080 = vrot.lane.b32.xlu0 %v1078_v11, %s2500_s4 }
 0xd5c   :  { %1141 = vrot.lane.b32.xlu1 %v1139_v12, %s2500_s4 }
 0xdcd   :  { %v1081_v17 = vpop.permute.xlu0 %1080 }
 0xdce   :  { %v1142_v18 = vpop.permute.xlu1 %1141  ;;  %v2893_v19 = vadd.f32 %v1081_v17, %v1073_v13 }
 0xdcf   :  { %v2895_v36 = vadd.f32 %v1142_v18, %v1134_v14 }
 0xdd0   :  { %2313 = vtanh.f32 %v2893_v19 }
 0xdd1   :  { %2315 = vtanh.f32 %v2895_v36 }
 0xdda   :  { %v2314_v20 = vpop.eup %2313 }
 0xddb   :  { %v2316_v21 = vpop.eup %2315  ;;  %1086 = vrot.lane.b32.xlu0 %v2314_v20, %s2500_s4 }
 0xddc   :  { %1147 = vrot.lane.b32.xlu1 %v2316_v21, %s2500_s4 }
 0xe4d   :  { %v1087_v22 = vpop.permute.xlu0 %1086 }
 0xe4e   :  { %v1148_v23 = vpop.permute.xlu1 %1147  ;;  %v2901_v24 = vmul.f32 %v1087_v22, %v1072_v8 }
 0xe4f   :  { %v1150_v26 = vmul.f32 %v1148_v23, %v1133_v9 }
 0xe50   :  { %v1090_v33 = vmax.f32 %v2856_v38, %v2901_v24  ;;  %v1152_v27 = vpack.c.bf16 %v2901_v24, %v2901_v24 }
 0xe51   :  { %v1151_v30 = vpack.c.bf16 %v1150_v26, %v1150_v26 }
 0xe52   :  { %1154 = vrot.lane.b32.xlu0 %v1152_v27, %s2489_s15 }
 0xe53   :  { %1200 = vrot.lane.b32.xlu1 %v1151_v30, %s2489_s15 }
 0xec4   :  { %v1155_v31 = vpop.permute.xlu0 %1154 }
 0xec5   :  { %v1201_v34 = vpop.permute.xlu1 %1200  ;;  %2160 = vmatmul.mubr.msk.bf16.vlgmr.msra.gmra.mrb[24].mxu0 %vm361_vm8, %v1155_v31 }
 0xec6   :  { %2168 = vmatmul.mubr.msk.bf16.vlgmr.msra.gmra.mrb[36].mxu1 %vm361_vm8, %v1201_v34  ;;  %2172 = vmatpush3.bf16.msra.mxu0 %v2634_v15 }
 0xec7   :  { %2173 = vmatprep.subr.bf16.mxu0 %v2495_v1  ;;  %2175 = vmatprep.mubr.msk.bf16.mxu0 %vm2496_vm0, %v2495_v1 }
 0xec8   :  { %2180 = vmatpush3.bf16.msra.mxu1 %v2673_v49  ;;  %2183 = vmatprep.mubr.msk.bf16.mxu1 %vm2496_vm0, %v2495_v1 }
 0xec9   :  { %2181 = vmatprep.subr.bf16.mxu1 %v2495_v1 }
 0xeca   :  { %2174 = vmatpush3.bf16.msra.mxu0 %v2637_v16 }
 0xecb   :  { %2187 = vmatprep.subr.bf16.mxu0 %v2495_v1 }
 0xecc   :  { %2182 = vmatpush3.bf16.msra.mxu1 %v2678_v51 }
 0xecd   :  { %2176 = vmatmul.mubr.msk.bf16.vlgmr.msra.gmra.mrb[28].mxu0 %vm361_vm8, %v1201_v34  ;;  %2195 = vmatprep.subr.bf16.mxu1 %v2495_v1 }
 0xece   :  { %2188 = vmatpush3.bf16.msra.mxu0 %v2675_v50  ;;  %2191 = vmatprep.mubr.msk.bf16.mxu0 %vm2496_vm0, %v2495_v1 }
 0xecf   :  { %2189 = vmatprep.subr.bf16.mxu0 %v2495_v1 }
 0xed2   :  { %2190 = vmatpush3.bf16.msra.mxu0 %v2683_v52 }
 0xed3   :  { %2203 = vmatprep.subr.bf16.mxu0 %v2495_v1 }
 0xf98   :  { %v1193_v35 = vpop.f32.mrb[24].mxu0 }
 0xf99   :  { %v1239_v37 = vpop.f32.mrb[36].mxu1  ;;  %v2161_v40 = vpop.f32.mrb[25].mxu0 }
 0xf9a   :  { %v1240_v42 = vadd.f32 %v1239_v37, %v1193_v35  ;;  %v2169_v43 = vpop.f32.mrb[37].mxu1  ;;  %v1196_v44 = vpop.f32.mrb[26].mxu0 }
 0xf9b   :  { %v1242_v45 = vpop.f32.mrb[38].mxu1  ;;  %v2162_v48 = vpop.f32.mrb[27].mxu0 }
 0xf9c   :  { %v1245_v29 = vadd.f32 %v2715_v62, %v1240_v42  ;;  %v2170_v46 = vpop.f32.mrb[39].mxu1 }
 0xf9e   :  { %2317 = vtanh.f32 %v1245_v29 }
 0xfa0   :  { %v1301_v32 = vpop.f32.mrb[28].mxu0 }
 0xfa1   :  { %v1302_v47 = vadd.f32 %v1301_v32, %v2785_v63  ;;  %v2177_v53 = vpop.f32.mrb[29].mxu0 }
 0xfa2   :  { %v1304_v54 = vpop.f32.mrb[30].mxu0 }
 0xfa3   :  { %2319 = vtanh.f32 %v1302_v47  ;;  %v2178_v55 = vpop.f32.mrb[31].mxu0 }
 0xfa8   :  { %v2318_v56 = vpop.eup %2317 }
 0xfa9   :  { %v1247_v57 = vmul.f32 %v2318_v56, %v2661_v39 }
 0xfab   :  { %v1248_v2 = vadd.f32 %v1247_v57, %v2664_v41 }
 0xfad   :  { %v2320_v58 = vpop.eup %2319  ;;  %1251 = vrot.lane.b32.xlu0 %v1248_v2, %s2500_s4  ;;  %v1249_v4 = vmul.f32 %v1248_v2, %v2893_v19 }
 0xfae   :  { %v1308_v7 = vmul.f32 %v2320_v58, %v2661_v39 }
 0xfb0   :  { %v1309_v59 = vadd.f32 %v1308_v7, %v2664_v41 }
 0xfb2   :  { %1312 = vrot.lane.b32.xlu1 %v1309_v59, %s2500_s4  ;;  %v1310_v8 = vmul.f32 %v1309_v59, %v2895_v36 }
0x101f   :  { %v1252_v60 = vpop.permute.xlu0 %1251 }
0x1020   :  { %v1254_v63 = vmul.f32 %v1252_v60, %v1248_v2 }
0x1022   :  { %1256 = vrot.lane.b32.xlu0 %v1254_v63, %s2500_s4 }
0x1024   :  { %v1313_v0 = vpop.permute.xlu1 %1312 }
0x1025   :  { %v1315_v3 = vmul.f32 %v1313_v0, %v1309_v59 }
0x1027   :  { %1317 = vrot.lane.b32.xlu1 %v1315_v3, %s2500_s4 }
0x1094   :  { %v1257_v5 = vpop.permute.xlu0 %1256 }
0x1095   :  { %v2941_v6 = vadd.f32 %v1257_v5, %v1249_v4 }
0x1097   :  { %2321 = vtanh.f32 %v2941_v6 }
0x1099   :  { %v1318_v9 = vpop.permute.xlu1 %1317 }
0x109a   :  { %v2945_v28 = vadd.f32 %v1318_v9, %v1310_v8  ;;  %v2345_v9 = vld [vmem:[#allocation7] sm:$0xff]  }
0x109c   :  { %2323 = vtanh.f32 %v2945_v28 }
0x10a1   :  { %v2322_v10 = vpop.eup %2321 }
0x10a2   :  { %1262 = vrot.lane.b32.xlu0 %v2322_v10, %s2500_s4 }
0x10a6   :  { %v2324_v11 = vpop.eup %2323 }
0x10a7   :  { %1323 = vrot.lane.b32.xlu1 %v2324_v11, %s2500_s4 }
0x1114   :  { %v1263_v12 = vpop.permute.xlu0 %1262 }
0x1115   :  { %v1265_v13 = vmul.f32 %v1263_v12, %v1248_v2 }
0x1117   :  { %v2953_v14 = vmax.f32 %v1090_v33, %v1265_v13  ;;  %v1328_v17 = vpack.c.bf16 %v1265_v13, %v1265_v13 }
0x1119   :  { %1330 = vrot.lane.b32.xlu0 %v1328_v17, %s2489_s15  ;;  %v1324_v18 = vpop.permute.xlu1 %1323 }
0x111a   :  { %v1326_v19 = vmul.f32 %v1324_v18, %v1309_v59 }
0x111c   :  { %v1327_v36 = vpack.c.bf16 %v1326_v19, %v1326_v19 }
0x111e   :  { %1376 = vrot.lane.b32.xlu1 %v1327_v36, %s2489_s15 }
0x118b   :  { %v1331_v20 = vpop.permute.xlu0 %1330 }
0x118c   :  { %2184 = vmatmul.mubr.msk.bf16.vlgmr.msra.gmra.mrb[40].mxu1 %vm361_vm8, %v1331_v20 }
0x118d   :  { %2196 = vmatpush3.bf16.msra.mxu1 %v2634_v15  ;;  %2199 = vmatprep.mubr.msk.bf16.mxu1 %vm2496_vm0, %v2495_v1 }
0x118e   :  { %2197 = vmatprep.subr.bf16.mxu1 %v2495_v1 }
0x1190   :  { %v1377_v38 = vpop.permute.xlu1 %1376 }
0x1191   :  { %2198 = vmatpush3.bf16.msra.mxu1 %v2637_v16  ;;  %2192 = vmatmul.mubr.msk.bf16.vlgmr.msra.gmra.mrb[32].mxu0 %vm361_vm8, %v1377_v38 }
0x1192   :  { %2204 = vmatpush3.bf16.msra.mxu0 %v2673_v49  ;;  %2211 = vmatprep.subr.bf16.mxu1 %v2495_v1 }
0x1193   :  { %2205 = vmatprep.subr.bf16.mxu0 %v2495_v1  ;;  %2207 = vmatprep.mubr.msk.bf16.mxu0 %vm2496_vm0, %v2495_v1 }
0x1194   :  { %2200 = vmatmul.mubr.msk.bf16.vlgmr.msra.gmra.mrb[44].mxu1 %vm361_vm8, %v1377_v38 }
0x1195   :  { %2212 = vmatpush3.bf16.msra.mxu1 %v2675_v50  ;;  %2215 = vmatprep.mubr.msk.bf16.mxu1 %vm2496_vm0, %v2495_v1 }
0x1196   :  { %2206 = vmatpush3.bf16.msra.mxu0 %v2678_v51  ;;  %2213 = vmatprep.subr.bf16.mxu1 %v2495_v1 }
0x1197   :  { %2219 = vmatprep.subr.bf16.mxu0 %v2495_v1 }
0x1199   :  { %2214 = vmatpush3.bf16.msra.mxu1 %v2683_v52 }
0x119a   :  { %2227 = vmatprep.subr.bf16.mxu1 %v2495_v1 }
0x125f   :  { %v1369_v15 = vpop.f32.mrb[40].mxu1 }
0x1260   :  { %v2185_v16 = vpop.f32.mrb[41].mxu1 }
0x1261   :  { %v1372_v21 = vpop.f32.mrb[42].mxu1 }
0x1262   :  { %v2186_v22 = vpop.f32.mrb[43].mxu1 }
0x1264   :  { %v1415_v23 = vpop.f32.mrb[32].mxu0 }
0x1265   :  { %v1416_v24 = vadd.f32 %v1415_v23, %v1369_v15  ;;  %v2193_v26 = vpop.f32.mrb[33].mxu0 }
0x1266   :  { %v1418_v33 = vpop.f32.mrb[34].mxu0 }
0x1267   :  { %v1421_v27 = vadd.f32 %v2715_v62, %v1416_v24  ;;  %v1477_v30 = vpop.f32.mrb[44].mxu1  ;;  %v2194_v31 = vpop.f32.mrb[35].mxu0 }
0x1268   :  { %v1478_v34 = vadd.f32 %v2779_v25, %v1477_v30  ;;  %v2201_v35 = vpop.f32.mrb[45].mxu1 }
0x1269   :  { %2325 = vtanh.f32 %v1421_v27  ;;  %v1480_v37 = vpop.f32.mrb[46].mxu1 }
0x126a   :  { %2327 = vtanh.f32 %v1478_v34  ;;  %v2202_v40 = vpop.f32.mrb[47].mxu1 }
0x1273   :  { %v2326_v42 = vpop.eup %2325 }
0x1274   :  { %v2328_v43 = vpop.eup %2327  ;;  %v1423_v44 = vmul.f32 %v2326_v42, %v2661_v39 }
0x1275   :  { %v1484_v45 = vmul.f32 %v2328_v43, %v2661_v39 }
0x1276   :  { %v1424_v48 = vadd.f32 %v1423_v44, %v2664_v41 }
0x1277   :  { %v1485_v29 = vadd.f32 %v1484_v45, %v2664_v41 }
0x1278   :  { %1427 = vrot.lane.b32.xlu0 %v1424_v48, %s2500_s4  ;;  %v1425_v53 = vmul.f32 %v1424_v48, %v2941_v6 }
0x1279   :  { %1488 = vrot.lane.b32.xlu1 %v1485_v29, %s2500_s4  ;;  %v1486_v54 = vmul.f32 %v1485_v29, %v2945_v28  ;;  %v2346_v28 = vld [vmem:[#allocation7 + $0x8] sm:$0xff]  }
0x12ea   :  { %v1428_v25 = vpop.permute.xlu0 %1427 }
0x12eb   :  { %v1489_v46 = vpop.permute.xlu1 %1488  ;;  %v1430_v32 = vmul.f32 %v1428_v25, %v1424_v48 }
0x12ec   :  { %v1491_v47 = vmul.f32 %v1489_v46, %v1485_v29 }
0x12ed   :  { %1432 = vrot.lane.b32.xlu0 %v1430_v32, %s2500_s4 }
0x12ee   :  { %1493 = vrot.lane.b32.xlu1 %v1491_v47, %s2500_s4 }
0x135f   :  { %v1433_v55 = vpop.permute.xlu0 %1432 }
0x1360   :  { %v1494_v56 = vpop.permute.xlu1 %1493  ;;  %v2990_v57 = vadd.f32 %v1433_v55, %v1425_v53 }
0x1361   :  { %v2992_v2 = vadd.f32 %v1494_v56, %v1486_v54 }
0x1362   :  { %2329 = vtanh.f32 %v2990_v57 }
0x1363   :  { %2331 = vtanh.f32 %v2992_v2 }
0x136c   :  { %v2330_v58 = vpop.eup %2329 }
0x136d   :  { %v2332_v7 = vpop.eup %2331  ;;  %1438 = vrot.lane.b32.xlu0 %v2330_v58, %s2500_s4 }
0x136e   :  { %1499 = vrot.lane.b32.xlu1 %v2332_v7, %s2500_s4 }
0x13df   :  { %v1439_v59 = vpop.permute.xlu0 %1438 }
0x13e0   :  { %v1500_v60 = vpop.permute.xlu1 %1499  ;;  %v2998_v63 = vmul.f32 %v1439_v59, %v1424_v48  ;;  %v2347_v59 = vld [vmem:[%s3084_s5] ss:$0 sm:$0xff] }
0x13e1   :  { %v1502_v0 = vmul.f32 %v1500_v60, %v1485_v29 }
0x13e2   :  { %v1442_v3 = vmax.f32 %v2953_v14, %v2998_v63  ;;  %v1504_v4 = vpack.c.bf16 %v2998_v63, %v2998_v63 }
0x13e3   :  { %v1503_v5 = vpack.c.bf16 %v1502_v0, %v1502_v0 }
0x13e4   :  { %1506 = vrot.lane.b32.xlu0 %v1504_v4, %s2489_s15 }
0x13e5   :  { %1552 = vrot.lane.b32.xlu1 %v1503_v5, %s2489_s15 }
0x1456   :  { %v1507_v6 = vpop.permute.xlu0 %1506 }
0x1457   :  { %v1553_v8 = vpop.permute.xlu1 %1552  ;;  %2208 = vmatmul.mubr.msk.bf16.vlgmr.msra.gmra.mrb[36].mxu0 %vm361_vm8, %v1507_v6 }
0x1458   :  { %2216 = vmatmul.mubr.msk.bf16.vlgmr.msra.gmra.mrb[48].mxu1 %vm361_vm8, %v1553_v8  ;;  %2220 = vmatpush3.bf16.msra.mxu0 %v2345_v9 }
0x1459   :  { %2221 = vmatprep.subr.bf16.mxu0 %v2495_v1  ;;  %2223 = vmatprep.mubr.msk.bf16.mxu0 %vm2496_vm0, %v2495_v1 }
0x145a   :  { %2228 = vmatpush3.bf16.msra.mxu1 %v2673_v49  ;;  %2231 = vmatprep.mubr.msk.bf16.mxu1 %vm2496_vm0, %v2495_v1 }
0x145b   :  { %2229 = vmatprep.subr.bf16.mxu1 %v2495_v1 }
0x145c   :  { %2222 = vmatpush3.bf16.msra.mxu0 %v2346_v28 }
0x145d   :  { %2235 = vmatprep.subr.bf16.mxu0 %v2495_v1 }
0x145e   :  { %2230 = vmatpush3.bf16.msra.mxu1 %v2678_v51 }
0x145f   :  { %2224 = vmatmul.mubr.msk.bf16.vlgmr.msra.gmra.mrb[40].mxu0 %vm361_vm8, %v1553_v8  ;;  %2243 = vmatprep.subr.bf16.mxu1 %v2495_v1 }
0x1460   :  { %2236 = vmatpush3.bf16.msra.mxu0 %v2675_v50  ;;  %2239 = vmatprep.mubr.msk.bf16.mxu0 %vm2496_vm0, %v2495_v1 }
0x1461   :  { %2237 = vmatprep.subr.bf16.mxu0 %v2495_v1 }
0x1464   :  { %2238 = vmatpush3.bf16.msra.mxu0 %v2683_v52 }
0x152a   :  { %v1545_v49 = vpop.f32.mrb[36].mxu0 }
0x152b   :  { %v1591_v10 = vpop.f32.mrb[48].mxu1  ;;  %v2209_v11 = vpop.f32.mrb[37].mxu0 }
0x152c   :  { %v1592_v12 = vadd.f32 %v1591_v10, %v1545_v49  ;;  %v2217_v13 = vpop.f32.mrb[49].mxu1  ;;  %v1548_v17 = vpop.f32.mrb[38].mxu0  ;;  %v2279_v49 = vld [vmem:[%s3085_s6] sm:$0xff]  }
0x152d   :  { %v1594_v51 = vpop.f32.mrb[50].mxu1  ;;  %v2210_v18 = vpop.f32.mrb[39].mxu0 }
0x152e   :  { %v1597_v19 = vadd.f32 %v2715_v62, %v1592_v12  ;;  %v2218_v36 = vpop.f32.mrb[51].mxu1  ;;  %v1924_v51 = vld [vmem:[%s3086_s7] ss:$0 sm:$0xff] }
0x1530   :  { %2333 = vtanh.f32 %v1597_v19 }
0x1532   :  { %v1653_v50 = vpop.f32.mrb[40].mxu0 }
0x1533   :  { %v1654_v20 = vadd.f32 %v2783_v61, %v1653_v50  ;;  %v2225_v38 = vpop.f32.mrb[41].mxu0 }
0x1534   :  { %v1656_v15 = vpop.f32.mrb[42].mxu0 }
0x1535   :  { %2335 = vtanh.f32 %v1654_v20  ;;  %v2226_v16 = vpop.f32.mrb[43].mxu0 }
0x153a   :  { %v2334_v52 = vpop.eup %2333 }
0x153b   :  { %v1599_v21 = vmul.f32 %v2334_v52, %v2661_v39 }
0x153d   :  { %v1600_v22 = vadd.f32 %v1599_v21, %v2664_v41 }
0x153f   :  { %v2336_v23 = vpop.eup %2335  ;;  %1603 = vrot.lane.b32.xlu0 %v1600_v22, %s2500_s4  ;;  %v1601_v30 = vmul.f32 %v1600_v22, %v2990_v57 }
0x1540   :  { %v1660_v24 = vmul.f32 %v2336_v23, %v2661_v39 }
0x1542   :  { %v1661_v62 = vadd.f32 %v1660_v24, %v2664_v41 }
0x1544   :  { %1664 = vrot.lane.b32.xlu1 %v1661_v62, %s2500_s4  ;;  %v1662_v35 = vmul.f32 %v1661_v62, %v2992_v2 }
0x15b1   :  { %v1604_v26 = vpop.permute.xlu0 %1603 }
0x15b2   :  { %v1606_v61 = vmul.f32 %v1604_v26, %v1600_v22 }
0x15b4   :  { %1608 = vrot.lane.b32.xlu0 %v1606_v61, %s2500_s4 }
0x15b6   :  { %v1665_v33 = vpop.permute.xlu1 %1664 }
0x15b7   :  { %v1667_v27 = vmul.f32 %v1665_v33, %v1661_v62 }
0x15b9   :  { %1669 = vrot.lane.b32.xlu1 %v1667_v27, %s2500_s4 }
0x1626   :  { %v1609_v31 = vpop.permute.xlu0 %1608 }
0x1627   :  { %v1611_v34 = vadd.f32 %v1609_v31, %v1601_v30 }
0x1629   :  { %2337 = vtanh.f32 %v1611_v34 }
0x162b   :  { %v1670_v37 = vpop.permute.xlu1 %1669 }
0x162c   :  { %v1672_v40 = vadd.f32 %v1670_v37, %v1662_v35 }
0x162e   :  { %2339 = vtanh.f32 %v1672_v40 }
0x1633   :  { %v2338_v42 = vpop.eup %2337 }
0x1634   :  { %1614 = vrot.lane.b32.xlu0 %v2338_v42, %s2500_s4 }
0x1638   :  { %v2340_v43 = vpop.eup %2339 }
0x1639   :  { %1675 = vrot.lane.b32.xlu1 %v2340_v43, %s2500_s4 }
0x16a6   :  { %v1615_v44 = vpop.permute.xlu0 %1614 }
0x16a7   :  { %v1617_v45 = vmul.f32 %v1615_v44, %v1600_v22 }
0x16a9   :  { %v1618_v48 = vmax.f32 %v1442_v3, %v1617_v45  ;;  %v1680_v29 = vpack.c.bf16 %v1617_v45, %v1617_v45 }
0x16ab   :  { %1682 = vrot.lane.b32.xlu0 %v1680_v29, %s2489_s15  ;;  %v1676_v25 = vpop.permute.xlu1 %1675 }
0x16ac   :  { %v1678_v46 = vmul.f32 %v1676_v25, %v1661_v62 }
0x16ae   :  { %v1679_v32 = vpack.c.bf16 %v1678_v46, %v1678_v46 }
0x16b0   :  { %1728 = vrot.lane.b32.xlu1 %v1679_v32, %s2489_s15 }
0x171d   :  { %v1683_v47 = vpop.permute.xlu0 %1682 }
0x171e   :  { %2232 = vmatmul.mubr.msk.bf16.vlgmr.msra.gmra.mrb[52].mxu1 %vm361_vm8, %v1683_v47 }
0x171f   :  { %2247 = vmatprep.mubr.msk.bf16.mxu1 %vm2496_vm0, %v2495_v1  ;;  %2244 = vmatpush3.bf16.msra.mxu1 %v2279_v49 }
0x1720   :  { %2245 = vmatprep.subr.bf16.mxu1 %v2495_v1 }
0x1722   :  { %v1729_v53 = vpop.permute.xlu1 %1728 }
0x1723   :  { %2240 = vmatmul.mubr.msk.bf16.vlgmr.msra.gmra.mrb[44].mxu0 %vm361_vm8, %v1729_v53 }
0x17f1   :  { %v1721_v54 = vpop.f32.mrb[52].mxu1 }
0x17f2   :  { %v2233_v14 = vpop.f32.mrb[53].mxu1 }
0x17f3   :  { %v1724_v55 = vpop.f32.mrb[54].mxu1 }
0x17f4   :  { %v2234_v56 = vpop.f32.mrb[55].mxu1 }
0x17f6   :  { %v1767_v57 = vpop.f32.mrb[44].mxu0 }
0x17f7   :  { %v1768_v2 = vadd.f32 %v1767_v57, %v1721_v54  ;;  %v2241_v58 = vpop.f32.mrb[45].mxu0 }
0x17f8   :  { %v1770_v7 = vpop.f32.mrb[46].mxu0 }
0x17f9   :  { %v1773_v60 = vadd.f32 %v2347_v59, %v1768_v2  ;;  %v2242_v63 = vpop.f32.mrb[47].mxu0 }
0x17fb   :  { %2341 = vtanh.f32 %v1773_v60 }
0x1805   :  { %v2342_v0 = vpop.eup %2341 }
0x1806   :  { %v1775_v3 = vmul.f32 %v2342_v0, %v2661_v39  ;;  %v2280_v39 = vld [vmem:[%s3085_s6 + $0x8] sm:$0xff]   ;;  %s2501_s6 = smov [#allocation11]  }
0x1807   :  { %2246 = vmatpush3.bf16.msra.mxu1 %v2280_v39  ;;  %s1872_s1 = sshll.u32 %s2501_s6, 4  ;;  %s1873_s1 = int_to_ptr.vmem [resolvable:$true] %s1872_s1 }
0x1808   :  { %v1776_v4 = vadd.f32 %v1775_v3, %v2664_v41  ;;  %s2458_s28 = scalar_lea.vmem %s1873_s1, 128  ;;  %p2463_p13 = scmp.lt.s32.totalorder %s1873_s1, %s1873_s1 }
0x1809   :  { %p2459_p12 = scmp.ne.s32.totalorder %s1873_s1, %s2458_s28  ;;  %p2464_p0 = scmp.lt.s32.totalorder %s2458_s28, %s2458_s28 }
0x180a   :  { %1779 = vrot.lane.b32.xlu0 %v1776_v4, %s2500_s4  ;;  %v1777_v8 = vmul.f32 %v1776_v4, %v1611_v34 }
0x180b   :  { %p2465_p1 = por %p2464_p0, %p2463_p13 }
0x180d   :  { %p2466_p2 = pnand %p2465_p1, %p2459_p12 }
0x187c   :  { %v1780_v5 = vpop.permute.xlu0 %1779 }
0x187d   :  { %v1782_v6 = vmul.f32 %v1780_v5, %v1776_v4 }
0x187f   :  { %1784 = vrot.lane.b32.xlu1 %v1782_v6, %s2500_s4 }
0x18f1   :  { %v1785_v9 = vpop.permute.xlu1 %1784 }
0x18f2   :  { %v1787_v28 = vadd.f32 %v1785_v9, %v1777_v8 }
0x18f4   :  { %2343 = vtanh.f32 %v1787_v28 }
0x18fe   :  { %v2344_v41 = vpop.eup %2343 }
0x18ff   :  { %1790 = vrot.lane.b32.xlu0 %v2344_v41, %s2500_s4 }
0x1971   :  { %v1791_v10 = vpop.permute.xlu0 %1790 }
0x1972   :  { %v1793_v11 = vmul.f32 %v1791_v10, %v1776_v4 }
0x1974   :  { %v1794_v12 = vmax.f32 %v1618_v48, %v1793_v11 }
0x1976   :  { %v1795_v13 = vpack.c.bf16 %v1794_v12, %v1794_v12 }
0x1978   :  { %1808 = vrot.lane.b32.xlu1 %v1795_v13, %s2489_s15 }
0x19ea   :  { %v1809_v17 = vpop.permute.xlu1 %1808 }
0x19eb   :  { %2248 = vmatmul.mubr.msk.bf16.vlgmr.msra.gmra.mrb[56].mxu1 %vm361_vm8, %v1809_v17 }
0x1abe   :  { %v1859_v1 = vpop.f32.mrb[56].mxu1 }
0x1abf   :  { %v1860_v18 = vadd.f32 %v1924_v51, %v1859_v1  ;;  %v2249_v19 = vpop.f32.mrb[57].mxu1 }
0x1ac0   :  { %v1862_v36 = vpop.f32.mrb[58].mxu1 }
0x1ac1   :  { %1865 = vst [vmem:[#allocation11] sm:$0xff] %v1860_v18  ;;  %v2250_v50 = vpop.f32.mrb[59].mxu1 }
0x1ac2   :  { %2469 = shalt.err (!%p2466_p2)
}
0x1ac3   :  { %s2470_s7 = scalar_lea.hbm %s3087_s8, 128 }
0x1ac4   :  { %p2471_p3 = scmp.ne.s32.totalorder %s3087_s8, %s2470_s7  ;;  %p2474_p4 = scmp.lt.u32.totalorder %s2470_s7, %s3087_s8 }
0x1ac6   :  { %p2476_p5 = pnand %p2474_p4, %p2471_p3 }
0x1ac8   :  { %2479 = shalt.err (!%p2476_p5)
}
0x1ac9   :  { %1875 = dma.vmem_to_hbm [thread:$0]  %s1873_s1, 128, %s3087_s8, [#allocation4]  }
0x1aca   :  { %2486 = dma.done.wait [#allocation4], 128  }
0x1acb   :  { %2487 = vsyncadd [#allocation4], 4294967168 }
0x1acc   :  { %1879 = vsyncpa [#allocation3], 1 }
0x1acd   :  { %1880 = vsyncpa [#allocation6], 1 }
0x1ace   :  { %1881 = vsyncpa [#allocation9], 1 }
0x1acf   :  { %1882 = vsyncpa [#allocation4], 1 }

</bundles_post_ra>
